<compile_context>
chip_gen: v6e
topology: v6e:2x2x1
jax: 0.10.0
libtpu: 0.0.40
codegen_flags: <defaults>
</compile_context>

<pallas_src>
import functools
import numpy as np
import jax
import jax.numpy as jnp
from jax import lax
from jax.experimental import pallas as pl
from jax.experimental.pallas import tpu as pltpu

INPUT_DIM = 3        # node feature dim produced by build_jsp_graph
HIDDEN = 128         # torch default hidden_dim
NUM_LAYERS = 3
BN_EPS = 1e-5


# ----------------------------------------------------------------------------
# Geometry-dependent graph constants (host numpy, built ONCE per geometry)
# ----------------------------------------------------------------------------
def _build_jsp_adjacency(J, M, num_machines):
    """Single-graph (A + I): conjunctive job chains + disjunctive machine cliques."""
    n = J * M
    adj = np.zeros((n, n), dtype=np.float32)          # adj[dst, src]
    for j in range(J):                                # conjunctive edges (both dirs)
        for k in range(M - 1):
            a, b = j * M + k, j * M + k + 1
            adj[b, a] += 1.0
            adj[a, b] += 1.0
    machine = (np.arange(J)[:, None] + np.arange(M)[None, :]) % num_machines
    for m in range(num_machines):                     # disjunctive cliques
        ops = [j * M + k for j in range(J) for k in range(M) if machine[j, k] == m]
        for p in ops:
            for q in ops:
                if p != q:
                    adj[q, p] += 1.0
    adj += np.eye(n, dtype=np.float32)                # (1 + eps) * x_i term, eps = 0
    return adj


@functools.lru_cache(maxsize=None)
def build_graph_constants(B, J, M, num_machines):
    """Device-resident (A (N,N), P (R,N) with R=ceil8(B), pos-template (N,HIDDEN)).

    Cached per geometry so the O(N^2) python loops and the host->device copy
    happen exactly once, not per forward call."""
    n = J * M
    N = B * n
    R = ((B + 7) // 8) * 8                            # pad pooled rows to full sublanes
    adj1 = _build_jsp_adjacency(J, M, num_machines)
    A = np.zeros((N, N), dtype=np.float32)
    P = np.zeros((R, N), dtype=np.float32)
    for g in range(B):
        A[g * n:(g + 1) * n, g * n:(g + 1) * n] = adj1
        P[g, g * n:(g + 1) * n] = 1.0 / n
    # positional-feature template: col 1 = j/J, col 2 = k/M, col 0 (proc) left 0
    tmpl = np.zeros((N, HIDDEN), dtype=np.float32)
    for g in range(B):
        for j in range(J):
            for k in range(M):
                r = g * n + j * M + k
                tmpl[r, 1] = j / max(J, 1)
                tmpl[r, 2] = k / max(M, 1)
    return jnp.asarray(A), jnp.asarray(P), jnp.asarray(tmpl)


# ----------------------------------------------------------------------------
# Parameter init (PyTorch nn.Linear-style uniform), packed into TWO stacks
#   W: (10, H, H)  bf16 = [l0_w1, l0_w2, l1_w1, l1_w2, l2_w1, l2_w2, proj, h1, h2, h3]
#   V: (16, H)     f32  = [b1,b2,gamma,beta] x 3 layers + [proj_b, h1_b, h2_b, h3_b]
# Sub-shapes are zero-padded to (H, H) / (H,) so the zero pads keep the math
# exactly equivalent to the un-padded layers.
# ----------------------------------------------------------------------------
def init_params(key):
    def linear(k, fan_in, fan_out):
        kw, kb = jax.random.split(k)
        bound = 1.0 / np.sqrt(fan_in)
        w = jax.random.uniform(kw, (fan_in, fan_out), minval=-bound, maxval=bound,
                               dtype=jnp.float32)
        b = jax.random.uniform(kb, (fan_out,), minval=-bound, maxval=bound,
                               dtype=jnp.float32)
        return w, b

    def pad_w(w):
        return jnp.pad(w, ((0, HIDDEN - w.shape[0]), (0, HIDDEN - w.shape[1])))

    def pad_v(b):
        return jnp.pad(b, ((0, HIDDEN - b.shape[0]),))

    keys = jax.random.split(key, 10)
    W_list, V_list = [], []
    # GIN layers: GINConv(MLP(in, H)) + BatchNorm1d(H)
    for i in range(NUM_LAYERS):
        fan_in = INPUT_DIM if i == 0 else HIDDEN
        w1, b1 = linear(keys[2 * i], fan_in, HIDDEN)
        w2, b2 = linear(keys[2 * i + 1], HIDDEN, HIDDEN)
        W_list += [pad_w(w1), pad_w(w2)]
        V_list += [pad_v(b1), pad_v(b2),
                   jnp.ones((HIDDEN,), jnp.float32),    # BN gamma
                   jnp.zeros((HIDDEN,), jnp.float32)]   # BN beta
    # encoder output_proj + head Linear(H,H)/ReLU/Linear(H,H//2)/ReLU/Linear(H//2,1)
    head_dims = [(HIDDEN, HIDDEN), (HIDDEN, HIDDEN), (HIDDEN, HIDDEN // 2), (HIDDEN // 2, 1)]
    for k, (fi, fo) in zip(keys[6:10], head_dims):
        w, b = linear(k, fi, fo)
        W_list.append(pad_w(w))
        V_list.append(pad_v(b))
    # bf16 weight stack (f32 accumulation in-kernel), f32 bias/BN stack
    return {'W': jnp.stack(W_list).astype(jnp.bfloat16),
            'V': jnp.stack(V_list)}


# ----------------------------------------------------------------------------
# Pallas kernel: full GIN encoder + MLP head for ONE instance (one grid step).
# Operands: proc (per-instance), tmpl / A / P / W / V (grid-resident, constant
# index_maps -> DMA'd once for the whole grid).
# ----------------------------------------------------------------------------
def gin_solver_kernel(proc_ref, tmpl_ref, a_ref, p_ref, w_ref, v_ref, out_ref):
    N = a_ref.shape[0]
    inv_n = 1.0 / N                         # static python float

    # Assemble node features in-kernel: X = tmpl + proc placed in lane 0.
    lane = lax.broadcasted_iota(jnp.int32, (1, HIDDEN), 1)
    col0 = (lane == 0).astype(jnp.float32)                  # one-hot lane mask
    h = tmpl_ref[...] + proc_ref[...] * col0                # (N, H)

    a = a_ref[...]                          # (N, N) block-diagonal (A + I), f32
    v = v_ref[...]                          # (16, H) biases / BN affine, f32
    # Constant row used to compute BN batch stats on the MXU (instead of XLU).
    ones_row = jnp.full((1, N), inv_n, dtype=jnp.float32)

    for i in range(NUM_LAYERS):
        w1 = w_ref[2 * i]                   # (H, H) bf16, static-index loads
        w2 = w_ref[2 * i + 1]
        b1 = v[4 * i:4 * i + 1, :]          # (1, H) static sublane slices
        b2 = v[4 * i + 1:4 * i + 2, :]
        gamma = v[4 * i + 2:4 * i + 3, :]
        beta = v[4 * i + 3:4 * i + 4, :]

        # GINConv (eps=0): mlp((A + I) @ h); +I is baked into `a`.
        agg = jnp.dot(a, h, preferred_element_type=jnp.float32)
        z = jnp.dot(agg.astype(jnp.bfloat16), w1,
                    preferred_element_type=jnp.float32) + b1
        z = jnp.maximum(z, 0.0)
        z = jnp.dot(z.astype(jnp.bfloat16), w2,
                    preferred_element_type=jnp.float32) + b2

        # BatchNorm1d, training-mode batch stats over the node axis.
        # Stats via MXU dots (XLU is the contended unit here); one-pass variance
        # E[z^2] - mean^2 clamped at 0 to avoid rsqrt NaNs from cancellation.
        mean = jnp.dot(ones_row, z, preferred_element_type=jnp.float32)       # (1, H)
        ez2 = jnp.dot(ones_row, z * z, preferred_element_type=jnp.float32)    # (1, H)
        var = jnp.maximum(ez2 - mean * mean, 0.0)
        z = (z - mean) * lax.rsqrt(var + BN_EPS) * gamma + beta
        h = jnp.maximum(z, 0.0)             # F.relu

    # global_mean_pool (P @ h, rows >= B are zero) + output_proj
    pooled = jnp.dot(p_ref[...], h, preferred_element_type=jnp.float32)       # (R, H)
    emb = jnp.dot(pooled.astype(jnp.bfloat16), w_ref[6],
                  preferred_element_type=jnp.float32) + v[12:13, :]

    # scoring head; last layers are zero-padded to H lanes so the final store is
    # a full unmasked (R, 128) slab (column 0 carries the scalar score).
    z = jnp.maximum(jnp.dot(emb.astype(jnp.bfloat16), w_ref[7],
                            preferred_element_type=jnp.float32) + v[13:14, :], 0.0)
    z = jnp.maximum(jnp.dot(z.astype(jnp.bfloat16), w_ref[8],
                            preferred_element_type=jnp.float32) + v[14:15, :], 0.0)
    out_ref[...] = jnp.dot(z.astype(jnp.bfloat16), w_ref[9],
                           preferred_element_type=jnp.float32) + v[15:16, :]


@jax.jit
def _forward_many_jit(xs, A, P, tmpl, W, V):
    I = xs.shape[0]
    N = A.shape[0]
    R = P.shape[0]
    proc = xs.reshape(I, N, 1).astype(jnp.float32)   # per-instance processing times

    out = pl.pallas_call(
        gin_solver_kernel,
        out_shape=jax.ShapeDtypeStruct((I, R, HIDDEN), jnp.float32),
        grid=(I,),
        in_specs=[
            pl.BlockSpec((None, N, 1), lambda i: (i, 0, 0)),          # proc: per-instance
            pl.BlockSpec((N, HIDDEN), lambda i: (0, 0)),              # tmpl: resident
            pl.BlockSpec((N, N), lambda i: (0, 0)),                   # A:    resident
            pl.BlockSpec((R, N), lambda i: (0, 0)),                   # P:    resident
            pl.BlockSpec((10, HIDDEN, HIDDEN), lambda i: (0, 0, 0)),  # W:    resident
            pl.BlockSpec((16, HIDDEN), lambda i: (0, 0)),             # V:    resident
        ],
        out_specs=pl.BlockSpec((None, R, HIDDEN), lambda i: (i, 0, 0)),
        compiler_params=pltpu.CompilerParams(dimension_semantics=("parallel",)),
    )(proc, tmpl, A, P, W, V)
    return out                                        # (I, R, HIDDEN)


def gin_solver_forward_many(xs, params, num_machines=5):
    """xs: (I, B, J, M) — I independent GINsolver.forward calls -> (I, B, 1)."""
    I, B, J, M = xs.shape
    A, P, tmpl = build_graph_constants(B, J, M, num_machines)   # cached, on device
    out = _forward_many_jit(xs, A, P, tmpl, params['W'], params['V'])
    return out[:, :B, :1]                             # lane-/row-dense slab, slice


def gin_solver_forward(x, params, num_machines=5):
    """x: (B, J, M) batch of JSP processing-time matrices -> (B, 1) scores."""
    return gin_solver_forward_many(x[None], params, num_machines)[0]


if __name__ == "__main__":
    key = jax.random.PRNGKey(0)
    kx, kp = jax.random.split(key)

    # 2 independent instances, each a batch of B=2 jobsets, J=4 jobs, M=5 machines
    I, B, J, M = 2, 2, 4, 5
    xs = jax.random.uniform(kx, (I, B, J, M), dtype=jnp.float32)

    params = init_params(kp)

    outs = gin_solver_forward_many(xs, params, num_machines=5)     # grid of 2 instances
    outs = jax.block_until_ready(outs)
    assert outs.shape == (I, B, 1) and outs.dtype == jnp.float32
    assert bool(jnp.all(jnp.isfinite(outs)))

    out1 = jax.block_until_ready(gin_solver_forward(xs[0], params))  # single-call API
    assert out1.shape == (B, 1)
    assert bool(jnp.allclose(out1, outs[0], atol=1e-5, rtol=1e-5))

    print("KERNEL_OK")
</pallas_src>

<mosaic_0001>
module attributes {stable_mosaic.version = 11 : i64} {
  func.func @gin_solver_kernel(%arg0: i32, %arg1: memref<1x40x1xf32, #tpu.memory_space<vmem>>, %arg2: memref<40x128xf32, #tpu.memory_space<vmem>>, %arg3: memref<40x40xf32, #tpu.memory_space<vmem>>, %arg4: memref<8x40xf32, #tpu.memory_space<vmem>>, %arg5: memref<10x128x128xbf16, #tpu.memory_space<vmem>>, %arg6: memref<16x128xf32, #tpu.memory_space<vmem>>, %arg7: memref<1x8x128xf32, #tpu.memory_space<vmem>>) attributes {dimension_semantics = [#tpu.dimension_semantics<parallel>], iteration_bounds = array<i64: 2>, scalar_prefetch = 0 : i64, scratch_operands = 0 : i64, tpu.core_type = #tpu.core_type<tc>, window_params = [{transform_indices = @transform_0, window_bounds = array<i64: 1, 40, 1>}, {pipeline_mode = #tpu.pipeline_mode<synchronous>, transform_indices = @transform_1, window_bounds = array<i64: 40, 128>}, {pipeline_mode = #tpu.pipeline_mode<synchronous>, transform_indices = @transform_2, window_bounds = array<i64: 40, 40>}, {pipeline_mode = #tpu.pipeline_mode<synchronous>, transform_indices = @transform_3, window_bounds = array<i64: 8, 40>}, {pipeline_mode = #tpu.pipeline_mode<synchronous>, transform_indices = @transform_4, window_bounds = array<i64: 10, 128, 128>}, {pipeline_mode = #tpu.pipeline_mode<synchronous>, transform_indices = @transform_5, window_bounds = array<i64: 16, 128>}, {transform_indices = @transform_6, window_bounds = array<i64: 1, 8, 128>}]} {
    %0 = tpu.iota {dimensions = array<i32: 1>} : vector<1x128xi32>
    %c0_i32 = arith.constant 0 : i32
    %1 = vector.broadcast %c0_i32 : i32 to vector<1x128xi32>
    %2 = arith.cmpi eq, %0, %1 : vector<1x128xi32>
    %3 = arith.extui %2 : vector<1x128xi1> to vector<1x128xi32>
    %4 = arith.sitofp %3 : vector<1x128xi32> to vector<1x128xf32>
    %c0 = arith.constant 0 : index
    %c0_0 = arith.constant 0 : index
    %5 = vector.load %arg2[%c0, %c0_0] : memref<40x128xf32, #tpu.memory_space<vmem>>, vector<40x128xf32>
    %c0_1 = arith.constant 0 : index
    %c0_2 = arith.constant 0 : index
    %c0_3 = arith.constant 0 : index
    %6 = vector.load %arg1[%c0_1, %c0_2, %c0_3] : memref<1x40x1xf32, #tpu.memory_space<vmem>>, vector<1x40x1xf32>
    %7 = vector.shape_cast %6 : vector<1x40x1xf32> to vector<40x1xf32>
    %8 = vector.broadcast %7 : vector<40x1xf32> to vector<40x128xf32>
    %9 = vector.broadcast %4 : vector<1x128xf32> to vector<40x128xf32>
    %10 = arith.mulf %8, %9 : vector<40x128xf32>
    %11 = arith.addf %5, %10 : vector<40x128xf32>
    %c0_4 = arith.constant 0 : index
    %c0_5 = arith.constant 0 : index
    %12 = vector.load %arg3[%c0_4, %c0_5] : memref<40x40xf32, #tpu.memory_space<vmem>>, vector<40x40xf32>
    %c0_6 = arith.constant 0 : index
    %c0_7 = arith.constant 0 : index
    %13 = vector.load %arg6[%c0_6, %c0_7] : memref<16x128xf32, #tpu.memory_space<vmem>>, vector<16x128xf32>
    %cst = arith.constant 2.500000e-02 : f32
    %14 = vector.broadcast %cst : f32 to vector<1x40xf32>
    %c0_8 = arith.constant 0 : index
    %c0_9 = arith.constant 0 : index
    %c0_10 = arith.constant 0 : index
    %15 = vector.load %arg5[%c0_8, %c0_9, %c0_10] : memref<10x128x128xbf16, #tpu.memory_space<vmem>>, vector<1x128x128xbf16>
    %16 = vector.shape_cast %15 : vector<1x128x128xbf16> to vector<128x128xbf16>
    %c1 = arith.constant 1 : index
    %c0_11 = arith.constant 0 : index
    %c0_12 = arith.constant 0 : index
    %17 = vector.load %arg5[%c1, %c0_11, %c0_12] : memref<10x128x128xbf16, #tpu.memory_space<vmem>>, vector<1x128x128xbf16>
    %18 = vector.shape_cast %17 : vector<1x128x128xbf16> to vector<128x128xbf16>
    %19 = vector.extract_strided_slice %13 {offsets = [0, 0], sizes = [1, 128], strides = [1, 1]} : vector<16x128xf32> to vector<1x128xf32>
    %20 = vector.extract_strided_slice %13 {offsets = [1, 0], sizes = [1, 128], strides = [1, 1]} : vector<16x128xf32> to vector<1x128xf32>
    %21 = vector.extract_strided_slice %13 {offsets = [2, 0], sizes = [1, 128], strides = [1, 1]} : vector<16x128xf32> to vector<1x128xf32>
    %22 = vector.extract_strided_slice %13 {offsets = [3, 0], sizes = [1, 128], strides = [1, 1]} : vector<16x128xf32> to vector<1x128xf32>
    %cst_13 = arith.constant dense<0.000000e+00> : vector<40x128xf32>
    %23 = tpu.matmul %12, %11, %cst_13 {dimension_numbers = #tpu.dot_dimension_numbers<[1], [0], [0], [1], [0, 0, 1, 1], [], []>} : vector<40x40xf32>, vector<40x128xf32>, vector<40x128xf32> -> vector<40x128xf32>
    %24 = arith.truncf %23 : vector<40x128xf32> to vector<40x128xbf16>
    %cst_14 = arith.constant dense<0.000000e+00> : vector<40x128xf32>
    %25 = tpu.matmul %24, %16, %cst_14 {dimension_numbers = #tpu.dot_dimension_numbers<[1], [0], [0], [1], [0, 0, 1, 1], [], []>} : vector<40x128xbf16>, vector<128x128xbf16>, vector<40x128xf32> -> vector<40x128xf32>
    %26 = vector.broadcast %19 : vector<1x128xf32> to vector<40x128xf32>
    %27 = arith.addf %25, %26 : vector<40x128xf32>
    %cst_15 = arith.constant 0.000000e+00 : f32
    %28 = vector.broadcast %cst_15 : f32 to vector<40x128xf32>
    %29 = arith.maximumf %27, %28 : vector<40x128xf32>
    %30 = arith.truncf %29 : vector<40x128xf32> to vector<40x128xbf16>
    %cst_16 = arith.constant dense<0.000000e+00> : vector<40x128xf32>
    %31 = tpu.matmul %30, %18, %cst_16 {dimension_numbers = #tpu.dot_dimension_numbers<[1], [0], [0], [1], [0, 0, 1, 1], [], []>} : vector<40x128xbf16>, vector<128x128xbf16>, vector<40x128xf32> -> vector<40x128xf32>
    %32 = vector.broadcast %20 : vector<1x128xf32> to vector<40x128xf32>
    %33 = arith.addf %31, %32 : vector<40x128xf32>
    %cst_17 = arith.constant dense<0.000000e+00> : vector<1x128xf32>
    %34 = tpu.matmul %14, %33, %cst_17 {dimension_numbers = #tpu.dot_dimension_numbers<[1], [0], [0], [1], [0, 0, 1, 1], [], []>} : vector<1x40xf32>, vector<40x128xf32>, vector<1x128xf32> -> vector<1x128xf32>
    %35 = arith.mulf %33, %33 : vector<40x128xf32>
    %cst_18 = arith.constant dense<0.000000e+00> : vector<1x128xf32>
    %36 = tpu.matmul %14, %35, %cst_18 {dimension_numbers = #tpu.dot_dimension_numbers<[1], [0], [0], [1], [0, 0, 1, 1], [], []>} : vector<1x40xf32>, vector<40x128xf32>, vector<1x128xf32> -> vector<1x128xf32>
    %37 = arith.mulf %34, %34 : vector<1x128xf32>
    %38 = arith.subf %36, %37 : vector<1x128xf32>
    %cst_19 = arith.constant 0.000000e+00 : f32
    %39 = vector.broadcast %cst_19 : f32 to vector<1x128xf32>
    %40 = arith.maximumf %38, %39 : vector<1x128xf32>
    %41 = vector.broadcast %34 : vector<1x128xf32> to vector<40x128xf32>
    %42 = arith.subf %33, %41 : vector<40x128xf32>
    %cst_20 = arith.constant 9.99999974E-6 : f32
    %43 = vector.broadcast %cst_20 : f32 to vector<1x128xf32>
    %44 = arith.addf %40, %43 : vector<1x128xf32>
    %45 = math.rsqrt %44 : vector<1x128xf32>
    %46 = vector.broadcast %45 : vector<1x128xf32> to vector<40x128xf32>
    %47 = arith.mulf %42, %46 : vector<40x128xf32>
    %48 = vector.broadcast %21 : vector<1x128xf32> to vector<40x128xf32>
    %49 = arith.mulf %47, %48 : vector<40x128xf32>
    %50 = vector.broadcast %22 : vector<1x128xf32> to vector<40x128xf32>
    %51 = arith.addf %49, %50 : vector<40x128xf32>
    %cst_21 = arith.constant 0.000000e+00 : f32
    %52 = vector.broadcast %cst_21 : f32 to vector<40x128xf32>
    %53 = arith.maximumf %51, %52 : vector<40x128xf32>
    %c2 = arith.constant 2 : index
    %c0_22 = arith.constant 0 : index
    %c0_23 = arith.constant 0 : index
    %54 = vector.load %arg5[%c2, %c0_22, %c0_23] : memref<10x128x128xbf16, #tpu.memory_space<vmem>>, vector<1x128x128xbf16>
    %55 = vector.shape_cast %54 : vector<1x128x128xbf16> to vector<128x128xbf16>
    %c3 = arith.constant 3 : index
    %c0_24 = arith.constant 0 : index
    %c0_25 = arith.constant 0 : index
    %56 = vector.load %arg5[%c3, %c0_24, %c0_25] : memref<10x128x128xbf16, #tpu.memory_space<vmem>>, vector<1x128x128xbf16>
    %57 = vector.shape_cast %56 : vector<1x128x128xbf16> to vector<128x128xbf16>
    %58 = vector.extract_strided_slice %13 {offsets = [4, 0], sizes = [1, 128], strides = [1, 1]} : vector<16x128xf32> to vector<1x128xf32>
    %59 = vector.extract_strided_slice %13 {offsets = [5, 0], sizes = [1, 128], strides = [1, 1]} : vector<16x128xf32> to vector<1x128xf32>
    %60 = vector.extract_strided_slice %13 {offsets = [6, 0], sizes = [1, 128], strides = [1, 1]} : vector<16x128xf32> to vector<1x128xf32>
    %61 = vector.extract_strided_slice %13 {offsets = [7, 0], sizes = [1, 128], strides = [1, 1]} : vector<16x128xf32> to vector<1x128xf32>
    %cst_26 = arith.constant dense<0.000000e+00> : vector<40x128xf32>
    %62 = tpu.matmul %12, %53, %cst_26 {dimension_numbers = #tpu.dot_dimension_numbers<[1], [0], [0], [1], [0, 0, 1, 1], [], []>} : vector<40x40xf32>, vector<40x128xf32>, vector<40x128xf32> -> vector<40x128xf32>
    %63 = arith.truncf %62 : vector<40x128xf32> to vector<40x128xbf16>
    %cst_27 = arith.constant dense<0.000000e+00> : vector<40x128xf32>
    %64 = tpu.matmul %63, %55, %cst_27 {dimension_numbers = #tpu.dot_dimension_numbers<[1], [0], [0], [1], [0, 0, 1, 1], [], []>} : vector<40x128xbf16>, vector<128x128xbf16>, vector<40x128xf32> -> vector<40x128xf32>
    %65 = vector.broadcast %58 : vector<1x128xf32> to vector<40x128xf32>
    %66 = arith.addf %64, %65 : vector<40x128xf32>
    %cst_28 = arith.constant 0.000000e+00 : f32
    %67 = vector.broadcast %cst_28 : f32 to vector<40x128xf32>
    %68 = arith.maximumf %66, %67 : vector<40x128xf32>
    %69 = arith.truncf %68 : vector<40x128xf32> to vector<40x128xbf16>
    %cst_29 = arith.constant dense<0.000000e+00> : vector<40x128xf32>
    %70 = tpu.matmul %69, %57, %cst_29 {dimension_numbers = #tpu.dot_dimension_numbers<[1], [0], [0], [1], [0, 0, 1, 1], [], []>} : vector<40x128xbf16>, vector<128x128xbf16>, vector<40x128xf32> -> vector<40x128xf32>
    %71 = vector.broadcast %59 : vector<1x128xf32> to vector<40x128xf32>
    %72 = arith.addf %70, %71 : vector<40x128xf32>
    %cst_30 = arith.constant dense<0.000000e+00> : vector<1x128xf32>
    %73 = tpu.matmul %14, %72, %cst_30 {dimension_numbers = #tpu.dot_dimension_numbers<[1], [0], [0], [1], [0, 0, 1, 1], [], []>} : vector<1x40xf32>, vector<40x128xf32>, vector<1x128xf32> -> vector<1x128xf32>
    %74 = arith.mulf %72, %72 : vector<40x128xf32>
    %cst_31 = arith.constant dense<0.000000e+00> : vector<1x128xf32>
    %75 = tpu.matmul %14, %74, %cst_31 {dimension_numbers = #tpu.dot_dimension_numbers<[1], [0], [0], [1], [0, 0, 1, 1], [], []>} : vector<1x40xf32>, vector<40x128xf32>, vector<1x128xf32> -> vector<1x128xf32>
    %76 = arith.mulf %73, %73 : vector<1x128xf32>
    %77 = arith.subf %75, %76 : vector<1x128xf32>
    %cst_32 = arith.constant 0.000000e+00 : f32
    %78 = vector.broadcast %cst_32 : f32 to vector<1x128xf32>
    %79 = arith.maximumf %77, %78 : vector<1x128xf32>
    %80 = vector.broadcast %73 : vector<1x128xf32> to vector<40x128xf32>
    %81 = arith.subf %72, %80 : vector<40x128xf32>
    %cst_33 = arith.constant 9.99999974E-6 : f32
    %82 = vector.broadcast %cst_33 : f32 to vector<1x128xf32>
    %83 = arith.addf %79, %82 : vector<1x128xf32>
    %84 = math.rsqrt %83 : vector<1x128xf32>
    %85 = vector.broadcast %84 : vector<1x128xf32> to vector<40x128xf32>
    %86 = arith.mulf %81, %85 : vector<40x128xf32>
    %87 = vector.broadcast %60 : vector<1x128xf32> to vector<40x128xf32>
    %88 = arith.mulf %86, %87 : vector<40x128xf32>
    %89 = vector.broadcast %61 : vector<1x128xf32> to vector<40x128xf32>
    %90 = arith.addf %88, %89 : vector<40x128xf32>
    %cst_34 = arith.constant 0.000000e+00 : f32
    %91 = vector.broadcast %cst_34 : f32 to vector<40x128xf32>
    %92 = arith.maximumf %90, %91 : vector<40x128xf32>
    %c4 = arith.constant 4 : index
    %c0_35 = arith.constant 0 : index
    %c0_36 = arith.constant 0 : index
    %93 = vector.load %arg5[%c4, %c0_35, %c0_36] : memref<10x128x128xbf16, #tpu.memory_space<vmem>>, vector<1x128x128xbf16>
    %94 = vector.shape_cast %93 : vector<1x128x128xbf16> to vector<128x128xbf16>
    %c5 = arith.constant 5 : index
    %c0_37 = arith.constant 0 : index
    %c0_38 = arith.constant 0 : index
    %95 = vector.load %arg5[%c5, %c0_37, %c0_38] : memref<10x128x128xbf16, #tpu.memory_space<vmem>>, vector<1x128x128xbf16>
    %96 = vector.shape_cast %95 : vector<1x128x128xbf16> to vector<128x128xbf16>
    %97 = vector.extract_strided_slice %13 {offsets = [8, 0], sizes = [1, 128], strides = [1, 1]} : vector<16x128xf32> to vector<1x128xf32>
    %98 = vector.extract_strided_slice %13 {offsets = [9, 0], sizes = [1, 128], strides = [1, 1]} : vector<16x128xf32> to vector<1x128xf32>
    %99 = vector.extract_strided_slice %13 {offsets = [10, 0], sizes = [1, 128], strides = [1, 1]} : vector<16x128xf32> to vector<1x128xf32>
    %100 = vector.extract_strided_slice %13 {offsets = [11, 0], sizes = [1, 128], strides = [1, 1]} : vector<16x128xf32> to vector<1x128xf32>
    %cst_39 = arith.constant dense<0.000000e+00> : vector<40x128xf32>
    %101 = tpu.matmul %12, %92, %cst_39 {dimension_numbers = #tpu.dot_dimension_numbers<[1], [0], [0], [1], [0, 0, 1, 1], [], []>} : vector<40x40xf32>, vector<40x128xf32>, vector<40x128xf32> -> vector<40x128xf32>
    %102 = arith.truncf %101 : vector<40x128xf32> to vector<40x128xbf16>
    %cst_40 = arith.constant dense<0.000000e+00> : vector<40x128xf32>
    %103 = tpu.matmul %102, %94, %cst_40 {dimension_numbers = #tpu.dot_dimension_numbers<[1], [0], [0], [1], [0, 0, 1, 1], [], []>} : vector<40x128xbf16>, vector<128x128xbf16>, vector<40x128xf32> -> vector<40x128xf32>
    %104 = vector.broadcast %97 : vector<1x128xf32> to vector<40x128xf32>
    %105 = arith.addf %103, %104 : vector<40x128xf32>
    %cst_41 = arith.constant 0.000000e+00 : f32
    %106 = vector.broadcast %cst_41 : f32 to vector<40x128xf32>
    %107 = arith.maximumf %105, %106 : vector<40x128xf32>
    %108 = arith.truncf %107 : vector<40x128xf32> to vector<40x128xbf16>
    %cst_42 = arith.constant dense<0.000000e+00> : vector<40x128xf32>
    %109 = tpu.matmul %108, %96, %cst_42 {dimension_numbers = #tpu.dot_dimension_numbers<[1], [0], [0], [1], [0, 0, 1, 1], [], []>} : vector<40x128xbf16>, vector<128x128xbf16>, vector<40x128xf32> -> vector<40x128xf32>
    %110 = vector.broadcast %98 : vector<1x128xf32> to vector<40x128xf32>
    %111 = arith.addf %109, %110 : vector<40x128xf32>
    %cst_43 = arith.constant dense<0.000000e+00> : vector<1x128xf32>
    %112 = tpu.matmul %14, %111, %cst_43 {dimension_numbers = #tpu.dot_dimension_numbers<[1], [0], [0], [1], [0, 0, 1, 1], [], []>} : vector<1x40xf32>, vector<40x128xf32>, vector<1x128xf32> -> vector<1x128xf32>
    %113 = arith.mulf %111, %111 : vector<40x128xf32>
    %cst_44 = arith.constant dense<0.000000e+00> : vector<1x128xf32>
    %114 = tpu.matmul %14, %113, %cst_44 {dimension_numbers = #tpu.dot_dimension_numbers<[1], [0], [0], [1], [0, 0, 1, 1], [], []>} : vector<1x40xf32>, vector<40x128xf32>, vector<1x128xf32> -> vector<1x128xf32>
    %115 = arith.mulf %112, %112 : vector<1x128xf32>
    %116 = arith.subf %114, %115 : vector<1x128xf32>
    %cst_45 = arith.constant 0.000000e+00 : f32
    %117 = vector.broadcast %cst_45 : f32 to vector<1x128xf32>
    %118 = arith.maximumf %116, %117 : vector<1x128xf32>
    %119 = vector.broadcast %112 : vector<1x128xf32> to vector<40x128xf32>
    %120 = arith.subf %111, %119 : vector<40x128xf32>
    %cst_46 = arith.constant 9.99999974E-6 : f32
    %121 = vector.broadcast %cst_46 : f32 to vector<1x128xf32>
    %122 = arith.addf %118, %121 : vector<1x128xf32>
    %123 = math.rsqrt %122 : vector<1x128xf32>
    %124 = vector.broadcast %123 : vector<1x128xf32> to vector<40x128xf32>
    %125 = arith.mulf %120, %124 : vector<40x128xf32>
    %126 = vector.broadcast %99 : vector<1x128xf32> to vector<40x128xf32>
    %127 = arith.mulf %125, %126 : vector<40x128xf32>
    %128 = vector.broadcast %100 : vector<1x128xf32> to vector<40x128xf32>
    %129 = arith.addf %127, %128 : vector<40x128xf32>
    %cst_47 = arith.constant 0.000000e+00 : f32
    %130 = vector.broadcast %cst_47 : f32 to vector<40x128xf32>
    %131 = arith.maximumf %129, %130 : vector<40x128xf32>
    %c0_48 = arith.constant 0 : index
    %c0_49 = arith.constant 0 : index
    %132 = vector.load %arg4[%c0_48, %c0_49] : memref<8x40xf32, #tpu.memory_space<vmem>>, vector<8x40xf32>
    %cst_50 = arith.constant dense<0.000000e+00> : vector<8x128xf32>
    %133 = tpu.matmul %132, %131, %cst_50 {dimension_numbers = #tpu.dot_dimension_numbers<[1], [0], [0], [1], [0, 0, 1, 1], [], []>} : vector<8x40xf32>, vector<40x128xf32>, vector<8x128xf32> -> vector<8x128xf32>
    %134 = arith.truncf %133 : vector<8x128xf32> to vector<8x128xbf16>
    %c6 = arith.constant 6 : index
    %c0_51 = arith.constant 0 : index
    %c0_52 = arith.constant 0 : index
    %135 = vector.load %arg5[%c6, %c0_51, %c0_52] : memref<10x128x128xbf16, #tpu.memory_space<vmem>>, vector<1x128x128xbf16>
    %136 = vector.shape_cast %135 : vector<1x128x128xbf16> to vector<128x128xbf16>
    %cst_53 = arith.constant dense<0.000000e+00> : vector<8x128xf32>
    %137 = tpu.matmul %134, %136, %cst_53 {dimension_numbers = #tpu.dot_dimension_numbers<[1], [0], [0], [1], [0, 0, 1, 1], [], []>} : vector<8x128xbf16>, vector<128x128xbf16>, vector<8x128xf32> -> vector<8x128xf32>
    %138 = vector.extract_strided_slice %13 {offsets = [12, 0], sizes = [1, 128], strides = [1, 1]} : vector<16x128xf32> to vector<1x128xf32>
    %139 = vector.broadcast %138 : vector<1x128xf32> to vector<8x128xf32>
    %140 = arith.addf %137, %139 : vector<8x128xf32>
    %141 = arith.truncf %140 : vector<8x128xf32> to vector<8x128xbf16>
    %c7 = arith.constant 7 : index
    %c0_54 = arith.constant 0 : index
    %c0_55 = arith.constant 0 : index
    %142 = vector.load %arg5[%c7, %c0_54, %c0_55] : memref<10x128x128xbf16, #tpu.memory_space<vmem>>, vector<1x128x128xbf16>
    %143 = vector.shape_cast %142 : vector<1x128x128xbf16> to vector<128x128xbf16>
    %cst_56 = arith.constant dense<0.000000e+00> : vector<8x128xf32>
    %144 = tpu.matmul %141, %143, %cst_56 {dimension_numbers = #tpu.dot_dimension_numbers<[1], [0], [0], [1], [0, 0, 1, 1], [], []>} : vector<8x128xbf16>, vector<128x128xbf16>, vector<8x128xf32> -> vector<8x128xf32>
    %145 = vector.extract_strided_slice %13 {offsets = [13, 0], sizes = [1, 128], strides = [1, 1]} : vector<16x128xf32> to vector<1x128xf32>
    %146 = vector.broadcast %145 : vector<1x128xf32> to vector<8x128xf32>
    %147 = arith.addf %144, %146 : vector<8x128xf32>
    %cst_57 = arith.constant 0.000000e+00 : f32
    %148 = vector.broadcast %cst_57 : f32 to vector<8x128xf32>
    %149 = arith.maximumf %147, %148 : vector<8x128xf32>
    %150 = arith.truncf %149 : vector<8x128xf32> to vector<8x128xbf16>
    %c8 = arith.constant 8 : index
    %c0_58 = arith.constant 0 : index
    %c0_59 = arith.constant 0 : index
    %151 = vector.load %arg5[%c8, %c0_58, %c0_59] : memref<10x128x128xbf16, #tpu.memory_space<vmem>>, vector<1x128x128xbf16>
    %152 = vector.shape_cast %151 : vector<1x128x128xbf16> to vector<128x128xbf16>
    %cst_60 = arith.constant dense<0.000000e+00> : vector<8x128xf32>
    %153 = tpu.matmul %150, %152, %cst_60 {dimension_numbers = #tpu.dot_dimension_numbers<[1], [0], [0], [1], [0, 0, 1, 1], [], []>} : vector<8x128xbf16>, vector<128x128xbf16>, vector<8x128xf32> -> vector<8x128xf32>
    %154 = vector.extract_strided_slice %13 {offsets = [14, 0], sizes = [1, 128], strides = [1, 1]} : vector<16x128xf32> to vector<1x128xf32>
    %155 = vector.broadcast %154 : vector<1x128xf32> to vector<8x128xf32>
    %156 = arith.addf %153, %155 : vector<8x128xf32>
    %cst_61 = arith.constant 0.000000e+00 : f32
    %157 = vector.broadcast %cst_61 : f32 to vector<8x128xf32>
    %158 = arith.maximumf %156, %157 : vector<8x128xf32>
    %159 = arith.truncf %158 : vector<8x128xf32> to vector<8x128xbf16>
    %c9 = arith.constant 9 : index
    %c0_62 = arith.constant 0 : index
    %c0_63 = arith.constant 0 : index
    %160 = vector.load %arg5[%c9, %c0_62, %c0_63] : memref<10x128x128xbf16, #tpu.memory_space<vmem>>, vector<1x128x128xbf16>
    %161 = vector.shape_cast %160 : vector<1x128x128xbf16> to vector<128x128xbf16>
    %cst_64 = arith.constant dense<0.000000e+00> : vector<8x128xf32>
    %162 = tpu.matmul %159, %161, %cst_64 {dimension_numbers = #tpu.dot_dimension_numbers<[1], [0], [0], [1], [0, 0, 1, 1], [], []>} : vector<8x128xbf16>, vector<128x128xbf16>, vector<8x128xf32> -> vector<8x128xf32>
    %163 = vector.extract_strided_slice %13 {offsets = [15, 0], sizes = [1, 128], strides = [1, 1]} : vector<16x128xf32> to vector<1x128xf32>
    %164 = vector.broadcast %163 : vector<1x128xf32> to vector<8x128xf32>
    %165 = arith.addf %162, %164 : vector<8x128xf32>
    %c0_65 = arith.constant 0 : index
    %c0_66 = arith.constant 0 : index
    %c0_67 = arith.constant 0 : index
    %166 = vector.load %arg7[%c0_65, %c0_66, %c0_67] : memref<1x8x128xf32, #tpu.memory_space<vmem>>, vector<1x8x128xf32>
    %167 = vector.shape_cast %166 : vector<1x8x128xf32> to vector<8x128xf32>
    %168 = vector.shape_cast %165 : vector<8x128xf32> to vector<1x8x128xf32>
    tpu.vector_store %arg7[%c0_65, %c0_66, %c0_67], %168 {strides = array<i32>} : memref<1x8x128xf32, #tpu.memory_space<vmem>>, vector<1x8x128xf32>,
    return
  }
  func.func @transform_0(%arg0: i32) -> (i32, i32, i32) {
    %c0_i32 = arith.constant 0 : i32
    %c0_i32_0 = arith.constant 0 : i32
    %c0_i32_1 = arith.constant 0 : i32
    return %arg0, %c0_i32, %c0_i32_0 : i32, i32, i32
  }
  func.func @transform_1(%arg0: i32) -> (i32, i32) {
    %c0_i32 = arith.constant 0 : i32
    %c0_i32_0 = arith.constant 0 : i32
    %c0_i32_1 = arith.constant 0 : i32
    return %c0_i32, %c0_i32_0 : i32, i32
  }
  func.func @transform_2(%arg0: i32) -> (i32, i32) {
    %c0_i32 = arith.constant 0 : i32
    %c0_i32_0 = arith.constant 0 : i32
    %c0_i32_1 = arith.constant 0 : i32
    return %c0_i32, %c0_i32_0 : i32, i32
  }
  func.func @transform_3(%arg0: i32) -> (i32, i32) {
    %c0_i32 = arith.constant 0 : i32
    %c0_i32_0 = arith.constant 0 : i32
    %c0_i32_1 = arith.constant 0 : i32
    return %c0_i32, %c0_i32_0 : i32, i32
  }
  func.func @transform_4(%arg0: i32) -> (i32, i32, i32) {
    %c0_i32 = arith.constant 0 : i32
    %c0_i32_0 = arith.constant 0 : i32
    %c0_i32_1 = arith.constant 0 : i32
    %c0_i32_2 = arith.constant 0 : i32
    return %c0_i32, %c0_i32_0, %c0_i32_1 : i32, i32, i32
  }
  func.func @transform_5(%arg0: i32) -> (i32, i32) {
    %c0_i32 = arith.constant 0 : i32
    %c0_i32_0 = arith.constant 0 : i32
    %c0_i32_1 = arith.constant 0 : i32
    return %c0_i32, %c0_i32_0 : i32, i32
  }
  func.func @transform_6(%arg0: i32) -> (i32, i32, i32) {
    %c0_i32 = arith.constant 0 : i32
    %c0_i32_0 = arith.constant 0 : i32
    %c0_i32_1 = arith.constant 0 : i32
    return %arg0, %c0_i32, %c0_i32_0 : i32, i32, i32
  }
}

</mosaic_0001>

<bundles_post_ra>
// kernel: _forward_many_jit.1
= control target key start
LH: loop header
LB: loop body
LE: loop exit
PB: predicated region body
PF: predicated region fallthrough
CT: control target
= control target key end

     0   :  { %11 = vsyncpa [#allocation3], 0  ;;  %s4226_s0 = inlined_call_operand.vmem [shape: f32[2,40,1], index: 0, kind: input, shape index: {}]   ;;  %s4227_s1 = inlined_call_operand.vmem [shape: f32[40,128], index: 1, kind: input, shape index: {}]   ;;  %s4228_s2 = inlined_call_operand.vmem [shape: f32[40,40], index: 2, kind: input, shape index: {}]   ;;  %s4229_s3 = inlined_call_operand.hbm [shape: f32[8,40], index: 3, kind: input, shape index: {}]   ;;  %s4230_s4 = inlined_call_operand.hbm [shape: bf16[10,128,128], index: 4, kind: input, shape index: {}]   ;;  %s4231_s5 = inlined_call_operand.vmem [shape: f32[16,128], index: 5, kind: input, shape index: {}]   ;;  %s4232_s6 = inlined_call_operand.hbm [shape: f32[2,8,128], index: 6, kind: output, shape index: {}]  }
   0x1   :  { %12 = vsyncpa [#allocation6], 0 }
   0x2   :  { %13 = vsyncpa [#allocation4], 0 }
   0x3   :  { %15 = vsyncpa [#allocation4 + $0x1], 0  ;;  %s3618_s21 = smov 0   ;;  %s3620_s22 = smov 0  }
   0x4   :  { %s3622_s23 = smov 0   ;;  %s3624_s24 = smov 0  }
   0x5 LB: > { %s3639_s25 = sadd.s32 4294967295, %s3572_s24   ;;  %s2592_s26 = sadd.s32 4294967294, %s3572_s24   ;;  %s3572_s24 = sphi %s3624_s24, %s4250_s24   ;;  %s3568_s23 = sphi %s3622_s23, %s4249_s23   ;;  %s3564_s22 = sphi %s3620_s22, %s4248_s22   ;;  %s3560_s21 = sphi %s3618_s21, %s4247_s21  }
   0x6   : > { %s3643_s27 = sadd.s32 1, %s3572_s24   ;;  %s159_s28 = sadd.s32 1, %s3568_s23 }
   0x7   : > { %s156_s29 = ssub.s32 %s3572_s24, %s3643_s27  ;;  %p169_p0 = scmp.ne.s32.totalorder %s3568_s23, %s3564_s22 }
   0x8   : > { %p157_p1 = scmp.eq.s32.totalorder %s156_s29, 0  ;;  %p170_p2 = scmp.eq.s32.totalorder %s3639_s25, 1 }
   0x9   : > { %p175_p3 = scmp.ne.s32.totalorder %s3564_s22, %s3560_s21  ;;  %p176_p4 = scmp.eq.s32.totalorder %s2592_s26, 1 }
   0xa   : > { %s3654_s30 = scalar_select %p157_p1, %s3568_s23, %s159_s28  }
   0xb   : > { %p3656_p5 = por %p170_p2, %p169_p0  ;;  %p3660_p6 = por %p176_p4, %p175_p3 }
   0xc   : > { %p2593_p7 = scmp.ge.s32.totalorder %s3572_s24, 1  ;;  %p183_p8 = scmp.lt.s32.totalorder %s3572_s24, 3 }
   0xd   : > { %s4236_s7 = scalar_select %p3656_p5, 1, 0 }
   0xe   : > { %s4237_s8 = scalar_select %p3660_p6, 1, 0 }
   0xf   : > { %p4233_p9 = scmp.eq.s32.totalorder %s3639_s25, 0  ;;  %p3667_p10 = pnand %p2593_p7, %p183_p8 }
  0x10   : > { %s3574_s10 = smov [#allocation2]   ;;  %s3575_s12 = smov [#allocation5]  }
  0x11   : > { %s4238_s9 = scalar_select %p3667_p10, 1, 0 }
  0x12   : > { %s202_s11 = sshll.u32 %s3574_s10, 4  ;;  %p3308_p11 = pneg %p3667_p10  ;;  %s203_s11 = int_to_ptr.vmem [resolvable:$true] %s202_s11 }
  0x13   : > { %s212_s13 = sshll.u32 %s3575_s12, 4  ;;  %s3463_s15 = scalar_lea.vmem %s203_s11, 128  ;;  %s213_s13 = int_to_ptr.vmem [resolvable:$true] %s212_s13 }
  0x14   : > { %p3675_p12 = pnand %p4233_p9, %p3308_p11  ;;  %p3464_p0 = scmp.ne.s32.totalorder %s203_s11, %s3463_s15 }
  0x15   : > { %p3471_p3 = scmp.lt.s32.totalorder %s203_s11, %s203_s11  ;;  %p3472_p4 = scmp.lt.s32.totalorder %s3463_s15, %s3463_s15 }
  0x16   : > { %p3454_p13 = pneg %p3675_p12 }
  0x17   : > { %p3473_p7 = por %p3472_p4, %p3471_p3 }
  0x18   : > { %p3466_p1 = pnand %p3464_p0, %p3454_p13 }
  0x1a   : > { %p3467_p2 = pneg %p3466_p1 }
  0x1c   : > { %p3474_p8 = pnand %p3473_p7, %p3467_p2 }
  0x1e   : > { %3477 = shalt.err (!%p3474_p8)
}
  0x1f   : > { %3311 = dma.hbm_to_vmem [thread:$0]  (!%p3675_p12), %s4229_s3, 128, %s203_s11, [#allocation3]  }
  0x20   : > { %s3489_s18 = scalar_lea.vmem %s213_s13, 10240  ;;  %p3497_p0 = scmp.lt.s32.totalorder %s213_s13, %s213_s13 }
  0x21   : > { %p3490_p11 = scmp.ne.s32.totalorder %s213_s13, %s3489_s18  ;;  %p3498_p1 = scmp.lt.s32.totalorder %s3489_s18, %s3489_s18 }
  0x23   : > { %p3492_p9 = pnand %p3490_p11, %p3454_p13  ;;  %p3499_p5 = por %p3498_p1, %p3497_p0 }
  0x25   : > { %p3493_p6 = pneg %p3492_p9 }
  0x27   : > { %p3500_p10 = pnand %p3499_p5, %p3493_p6 }
  0x29   : > { %3503 = shalt.err (!%p3500_p10)
}
  0x2a   : > { %s3576_s19 = smov 64   ;;  %s3577_s20 = smov 4  }
  0x2b   : > { %3314 = dma.hbm_to_vmem [thread:$0]  (!%p3675_p12), %s4230_s4, 10240, %s213_s13, [#allocation6], %s3576_s19, %s3576_s19, %s3577_s20  }
  0x2c   : > { %p4240_p2 = scmp.ne.s32.totalorder %s4238_s9, 0 }
  0x2d   : > { %p4241_p3 = scmp.eq.s32.totalorder (!%p4240_p2), %s3639_s25, 0 }
  0x2e   : > { %239 = sbr.rel (%p4240_p2) target bundleno = 3769 (0xeb9), region = 44 }
  0x33   : > { %3547 = dma.done.wait (%p4241_p3), [#allocation3], 128   ;;  %p4242_p9 = pmov %p4241_p3 }
  0x34   : > { %p4243_p5 = pmov %p4241_p3 }
  0x35   : > { %3549 = vsyncadd (%p4242_p9), [#allocation3], 4294967168 }
  0x36   : > { %3551 = dma.done.wait (%p4243_p5), [#allocation6], 10240   ;;  %p4244_p6 = pmov %p4241_p3 }
  0x37   : > { %p273_p10 = scmp.lt.s32.totalorder %s3639_s25, 1  ;;  %v3578_v0 = vmov 0   ;;  %v3579_v1 = vmov 0.0   ;;  %vm3580_vm0 = vmmov 0   ;;  %v3366_v7 = vld [vmem:[#allocation5 + $0x38] sm:$0xff]   ;;  %v3367_v8 = vld [vmem:[#allocation5 + $0x30] sm:$0xff]   ;;  %v279_v13 = vlaneseq }
  0x38   : > { %3553 = vsyncadd (%p4244_p6), [#allocation6], 4294957056  ;;  %3365 = vset.pattern.permute.xlu1 %v3578_v0  ;;  %3364 = vset.pattern.permute.xlu0 %v3578_v0  ;;  %v3368_v9 = vld [vmem:[#allocation5 + $0x28] sm:$0xff]   ;;  %v3369_v10 = vld [vmem:[#allocation5 + $0x20] sm:$0xff]   ;;  %vm369_vm2 = vcmask 326656   ;;  %s270_s28 = sand.u32 1, %s3564_s22  }
  0x39   : > { %s274_s29 = scalar_select %p273_p10, %s3639_s25, 1  ;;  %2883 = vmatprep.subr.mxu0 %v3579_v1  ;;  %2908 = vmatprep.subr.bf16.mxu1 %v3579_v1  ;;  %v3370_v11 = vld [vmem:[#allocation5 + $0x18] sm:$0xff]   ;;  %v3371_v12 = vld [vmem:[#allocation5 + $0x10] sm:$0xff]   ;;  %v280_v14 = vand.u32 127, %v279_v13  ;;  %v286_v26 = vld [vmem:[%s4227_s1 + $0x10] sm:$0xff]  ;;  %v3808_v0 = vshrl.u32 %v279_v13, 7 }
  0x3a   : > { %2893 = vmatprep.mubr.msk.f32.mxu0 %vm3580_vm0, %v3579_v1  ;;  %2924 = vmatprep.mubr.msk.bf16.mxu1 %vm3580_vm0, %v3579_v1  ;;  %v288_v18 = vld [vmem:[%s4227_s1 + $0x20] sm:$0xff]  ;;  %v287_v22 = vld [vmem:[%s4227_s1 + $0x18] sm:$0xff]  ;;  %v285_v29 = vld [vmem:[%s4227_s1 + $0x8] sm:$0xff]  ;;  %s2498_s15 = scalar_lea.sflag [#allocation4], %s270_s28  ;;  %p4245_p13 = scmp.ne.s32.totalorder %s4236_s7, 0 }
  0x3b   : > { %s3297_s9 = smul.u32 40, %s274_s29  ;;  %2909 = vmatpush3.bf16.msra.mxu1 %v3366_v7  ;;  %vm281_vm1 = vcmp.eq.s32.totalorder %v280_v14, 0  ;;  %v284_v33 = vld [vmem:[%s4227_s1] sm:$0xff]  ;;  %v3758_v37 = vld [vmem:[%s4228_s2 + $0x8] sm:$0xff]  ;;  %v3767_v38 = vld [vmem:[%s4228_s2 + $0x10] sm:$0xff]  ;;  %s2600_s29 = sshll.u32 %s270_s28, 3 }
  0x3c   : > { %2910 = vmatprep.subr.bf16.mxu1 %v3579_v1  ;;  %v2602_v15 = vsel %vm281_vm1, 1.0, %v3579_v1  ;;  %v3747_v36 = vld [vmem:[%s4228_s2] sm:$0xff]  ;;  %v3776_v39 = vld [vmem:[%s4228_s2 + $0x18] sm:$0xff]  ;;  %v3372_v41 = vld [vmem:[#allocation5 + $0x8] sm:$0xff]   ;;  %s272_s10 = scalar_lea.vmem [#allocation7], %s2600_s29 }
  0x3d   : > { %s277_s12 = scalar_lea.vmem %s4226_s0, %s3297_s9  ;;  %v3785_v40 = vld [vmem:[%s4228_s2 + $0x20] sm:$0xff]  ;;  %v3373_v42 = vld [vmem:[#allocation5] sm:$0xff]   ;;  %v3375_v44 = vld [vmem:[#allocation5 + $0x70] sm:$0xff]   ;;  %s2706_s9 = sshll.u32 %s3639_s25, 7 }
  0x3e   : > { %v293_v2 = vld [vmem:[%s277_s12 + $0x20] sm:$0xff]  ;;  %v291_v3 = vld [vmem:[%s277_s12 + $0x10] sm:$0xff]  ;;  %v292_v4 = vld [vmem:[%s277_s12 + $0x18] sm:$0xff]  ;;  %s2511_s11 = sshll.u32 %s272_s10, 4  ;;  %s4185_s14 = scalar_lea.hbm %s4232_s6, %s2706_s9  ;;  %s4187_s11 = int_to_ptr.vmem [resolvable:$true] %s2511_s11 }
  0x3f   : > { %316 = vperm.xlu0 %3364, %v293_v2   ;;  %306 = vperm.xlu1 %3365, %v291_v3   ;;  %v290_v5 = vld [vmem:[%s277_s12 + $0x8] sm:$0xff]  ;;  %v289_v6 = vld [vmem:[%s277_s12] sm:$0xff]  ;;  %v3376_v45 = vld [vmem:[#allocation5 + $0x68] sm:$0xff]   ;;  %v3811_v2 = vsub.s32 0, %v3808_v0  ;;  %s3504_s16 = scalar_lea.vmem %s4187_s11, 128  ;;  %s3582_s25 = smov [#allocation7]  }
  0x40   : > { %2911 = vmatpush3.bf16.msra.mxu1 %v3367_v8  ;;  %v3374_v43 = vld [vmem:[#allocation5 + $0x78] sm:$0xff]   ;;  %v3377_v46 = vld [vmem:[#allocation5 + $0x60] sm:$0xff]   ;;  %v3379_v61 = vld [vmem:[#allocation5 + $0x50] sm:$0xff]   ;;  %p3505_p12 = scmp.ne.s32.totalorder %s4187_s11, %s3504_s16  ;;  %s3508_s17 = sshll.u32 %s3582_s25, 4  ;;  %s3509_s17 = int_to_ptr.vmem [resolvable:$false] %s3508_s17 }
  0x41   : > { %2912 = vmatprep.subr.bf16.mxu1 %v3579_v1  ;;  %v3378_v47 = vld [vmem:[#allocation5 + $0x58] sm:$0xff]   ;;  %v3380_v62 = vld [vmem:[#allocation5 + $0x48] sm:$0xff]   ;;  %v3381_v63 = vld [vmem:[#allocation5 + $0x40] sm:$0xff]   ;;  %s3510_s18 = scalar_lea.vmem %s3509_s17, 256  ;;  %p3511_p8 = scmp.lt.s32.totalorder %s4187_s11, %s3509_s17 }
  0x42   : > { %v3816_v3 = vld [vmem:[%s4231_s5] sm:$0xff]  ;;  %p3506_p4 = pnand %p3505_p12, %p4245_p13  ;;  %p3512_p11 = scmp.lt.s32.totalorder %s3510_s18, %s3504_s16 }
  0x43   : > { %311 = vperm.xlu0 %3364, %v292_v4   ;;  %301 = vperm.xlu1 %3365, %v290_v5   ;;  %v481_v4 = vrot.slane %v3816_v3, %v3811_v2 }
  0x44   : > { %2913 = vmatpush3.bf16.msra.mxu1 %v3368_v9  ;;  %p3507_p7 = pneg %p3506_p4  ;;  %p3513_p0 = por %p3512_p11, %p3511_p8 }
  0x45   : > { %2914 = vmatprep.subr.bf16.mxu1 %v3579_v1 }
  0x46   : > { %p3514_p1 = pnand %p3513_p0, %p3507_p7 }
  0x47   : > { %296 = vperm.xlu0 %3364, %v289_v6  }
  0x48   : > { %2915 = vmatpush3.bf16.msra.mxu1 %v3369_v10 }
  0x49   : > { %2916 = vmatprep.subr.bf16.mxu1 %v3579_v1 }
  0x4c   : > { %2917 = vmatpush3.bf16.msra.mxu1 %v3370_v11 }
  0x4d   : > { %2918 = vmatprep.subr.bf16.mxu1 %v3579_v1 }
  0x50   : > { %2919 = vmatpush3.bf16.msra.mxu1 %v3371_v12 }
  0x51   : > { %2920 = vmatprep.subr.bf16.mxu1 %v3579_v1 }
  0x54   : > { %2921 = vmatpush3.bf16.msra.mxu1 %v3372_v41  ;;  %v596_v41 = vsub.s32 1, %v3808_v0 }
  0x55   : > { %2922 = vmatprep.subr.bf16.mxu1 %v3579_v1 }
  0x58   : > { %2923 = vmatpush3.bf16.msra.mxu1 %v3373_v42 }
  0x59   : > { %2964 = vmatprep.subr.mxu1 %v3579_v1 }
  0xba   : > { %v317_v16 = vpop.permute.xlu0 %316  ;;  %v307_v17 = vpop.permute.xlu1 %306 }
  0xbb   : > { %v323_v19 = vmul.f32 %v2602_v15, %v317_v16  ;;  %v321_v24 = vmul.f32 %v2602_v15, %v307_v17 }
  0xbd   : > { %v328_v20 = vadd.f32 %v323_v19, %v288_v18  ;;  %v326_v31 = vadd.f32 %v321_v24, %v286_v26 }
  0xbe   : > { %v312_v21 = vpop.permute.xlu0 %311  ;;  %v302_v23 = vpop.permute.xlu1 %301 }
  0xbf   : > { %v322_v25 = vmul.f32 %v2602_v15, %v312_v21  ;;  %2884 = vmatpush3.msra.mxu0 %v328_v20  ;;  %v320_v28 = vmul.f32 %v2602_v15, %v302_v23 }
  0xc0   : > { %2885 = vmatprep.subr.mxu0 %v3579_v1 }
  0xc1   : > { %v327_v27 = vadd.f32 %v322_v25, %v287_v22  ;;  %v325_v34 = vadd.f32 %v320_v28, %v285_v29 }
  0xc2   : > { %v297_v30 = vpop.permute.xlu0 %296 }
  0xc3   : > { %v319_v32 = vmul.f32 %v2602_v15, %v297_v30  ;;  %2886 = vmatpush3.msra.mxu0 %v327_v27 }
  0xc4   : > { %2887 = vmatprep.subr.mxu0 %v3579_v1 }
  0xc5   : > { %2888 = vmatpush3.msra.mxu0 %v326_v31  ;;  %v324_v35 = vadd.f32 %v319_v32, %v284_v33 }
  0xc6   : > { %2889 = vmatprep.subr.mxu0 %v3579_v1 }
  0xc7   : > { %2890 = vmatpush3.msra.mxu0 %v325_v34 }
  0xc8   : > { %2891 = vmatprep.subr.mxu0 %v3579_v1 }
  0xc9   : > { %2892 = vmatpush3.msra.mxu0 %v324_v35 }
  0xca   : > { %2894 = vmatmul.mubr.msk.f32.vlgmr.msra.gmra.mxu0 %vm369_vm2, %v3747_v36  ;;  %2936 = vmatprep.subr.bf16.mxu0 %v3579_v1 }
  0xcb   : > { %2896 = vmatprep.mubr.msk.f32.mxu0 %vm3580_vm0, %v3579_v1  ;;  %2937 = vmatpush3.bf16.msra.mxu0 %v3374_v43 }
  0xcc   : > { %2938 = vmatprep.subr.bf16.mxu0 %v3579_v1 }
  0xce   : > { %2897 = vmatmul.mubr.msk.f32.gmra.mxu0 %vm369_vm2, %v3758_v37 }
  0xcf   : > { %2899 = vmatprep.mubr.msk.f32.mxu0 %vm3580_vm0, %v3579_v1  ;;  %2939 = vmatpush3.bf16.msra.mxu0 %v3375_v44  ;;  %v597_v44 = vrot.slane %v3816_v3, %v596_v41 }
  0xd0   : > { %2940 = vmatprep.subr.bf16.mxu0 %v3579_v1 }
  0xd2   : > { %2900 = vmatmul.mubr.msk.f32.gmra.mxu0 %vm369_vm2, %v3767_v38 }
  0xd3   : > { %2902 = vmatprep.mubr.msk.f32.mxu0 %vm3580_vm0, %v3579_v1  ;;  %2941 = vmatpush3.bf16.msra.mxu0 %v3376_v45 }
  0xd4   : > { %2942 = vmatprep.subr.bf16.mxu0 %v3579_v1 }
  0xd6   : > { %2903 = vmatmul.mubr.msk.f32.gmra.mxu0 %vm369_vm2, %v3776_v39 }
  0xd7   : > { %2905 = vmatprep.mubr.msk.f32.mxu0 %vm3580_vm0, %v3579_v1  ;;  %2943 = vmatpush3.bf16.msra.mxu0 %v3377_v46 }
  0xd8   : > { %2944 = vmatprep.subr.bf16.mxu0 %v3579_v1 }
  0xda   : > { %2906 = vmatmul.mubr.msk.f32.gmra.mxu0 %vm369_vm2, %v3785_v40 }
  0xdb   : > { %2952 = vmatprep.mubr.msk.bf16.mxu0 %vm3580_vm0, %v3579_v1  ;;  %2945 = vmatpush3.bf16.msra.mxu0 %v3378_v47 }
  0xdc   : > { %2946 = vmatprep.subr.bf16.mxu0 %v3579_v1 }
  0xdf   : > { %2947 = vmatpush3.bf16.msra.mxu0 %v3379_v61  ;;  %v3383_v61 = vld [vmem:[#allocation5 + $0xb0] sm:$0xff]  }
  0xe0   : > { %2948 = vmatprep.subr.bf16.mxu0 %v3579_v1 }
  0xe3   : > { %2949 = vmatpush3.bf16.msra.mxu0 %v3380_v62  ;;  %v3384_v62 = vld [vmem:[#allocation5 + $0xa8] sm:$0xff]  }
  0xe4   : > { %2950 = vmatprep.subr.bf16.mxu0 %v3579_v1 }
  0xe7   : > { %2951 = vmatpush3.bf16.msra.mxu0 %v3381_v63  ;;  %v3385_v63 = vld [vmem:[#allocation5 + $0xa0] sm:$0xff]  }
  0xe8   : > { %2977 = vmatprep.subr.mxu0 %v3579_v1 }
 0x18a   : > { %v451_v48 = vpop.f32.mrf.mxu0 }
 0x18c   : > { %v2895_v49 = vpop.f32.mrf.mxu0 }
 0x18e   : > { %v456_v50 = vpop.f32.mrf.mxu0 }
 0x18f   : > { %v475_v51 = vpack.c.bf16 %v456_v50, %v451_v48 }
 0x190   : > { %v2898_v52 = vpop.f32.mrf.mxu0 }
 0x191   : > { %2925 = vmatmul.mubr.bf16.vlgmr.msra.gmra.mxu1 %v475_v51 }
 0x192   : > { %v461_v53 = vpop.f32.mrf.mxu0  ;;  %2928 = vmatprep.mubr.msk.bf16.mxu1 %vm3580_vm0, %v3579_v1 }
 0x194   : > { %v2901_v54 = vpop.f32.mrf.mxu0 }
 0x196   : > { %v466_v55 = vpop.f32.mrf.mxu0 }
 0x197   : > { %v476_v56 = vpack.c.bf16 %v466_v55, %v461_v53 }
 0x198   : > { %v2904_v57 = vpop.f32.mrf.mxu0 }
 0x199   : > { %2929 = vmatmul.mubr.bf16.gmra.mxu1 %v476_v56 }
 0x19a   : > { %v471_v58 = vpop.f32.mrf.mxu0  ;;  %2932 = vmatprep.mubr.msk.bf16.mxu1 %vm3580_vm0, %v3579_v1 }
 0x19b   : > { %v477_v60 = vpack.c.bf16 %v471_v58, %v471_v58 }
 0x19c   : > { %v2907_v59 = vpop.f32.mrf.mxu0 }
 0x19d   : > { %v3581_v59 = vmov 0.025  }
 0x1a1   : > { %2933 = vmatmul.mubr.bf16.gmra.mxu1 %v477_v60  ;;  %v3382_v60 = vld [vmem:[#allocation5 + $0xb8] sm:$0xff]  }
 0x1a2   : > { %2974 = vmatprep.mubr.msk.f32.mxu1 %vm3580_vm0, %v3579_v1 }
 0x251   : > { %v564_v5 = vpop.f32.mrf.mxu1 }
 0x252   : > { %v565_v7 = vadd.f32 %v564_v5, %v481_v4  ;;  %v3387_v5 = vld [vmem:[#allocation5 + $0x90] sm:$0xff]  }
 0x253   : > { %v2926_v6 = vpop.f32.mrf.mxu1 }
 0x254   : > { %v586_v11 = vmax.f32 %v565_v7, 0.0 }
 0x255   : > { %v567_v8 = vpop.f32.mrf.mxu1 }
 0x256   : > { %v568_v9 = vadd.f32 %v567_v8, %v481_v4 }
 0x257   : > { %v2927_v10 = vpop.f32.mrf.mxu1 }
 0x258   : > { %v587_v12 = vmax.f32 %v568_v9, 0.0 }
 0x259   : > { %v572_v13 = vpop.f32.mrf.mxu1 }
 0x25a   : > { %v591_v14 = vpack.c.bf16 %v587_v12, %v586_v11  ;;  %v573_v16 = vadd.f32 %v572_v13, %v481_v4 }
 0x25b   : > { %v2930_v15 = vpop.f32.mrf.mxu1 }
 0x25c   : > { %2953 = vmatmul.mubr.bf16.vlgmr.msra.gmra.mxu0 %v591_v14  ;;  %v588_v20 = vmax.f32 %v573_v16, 0.0  ;;  %v875_v15 = vsub.s32 2, %v3808_v0  ;;  %v884_v16 = vsub.s32 3, %v3808_v0 }
 0x25d   : > { %v575_v17 = vpop.f32.mrf.mxu1  ;;  %2956 = vmatprep.mubr.msk.bf16.mxu0 %vm3580_vm0, %v3579_v1 }
 0x25e   : > { %v576_v18 = vadd.f32 %v575_v17, %v481_v4 }
 0x25f   : > { %v2931_v19 = vpop.f32.mrf.mxu1 }
 0x260   : > { %v589_v21 = vmax.f32 %v576_v18, 0.0  ;;  %v876_v19 = vrot.slane %v3816_v3, %v875_v15 }
 0x261   : > { %v580_v22 = vpop.f32.mrf.mxu1 }
 0x262   : > { %v592_v23 = vpack.c.bf16 %v589_v21, %v588_v20  ;;  %v581_v24 = vadd.f32 %v580_v22, %v481_v4  ;;  %v3386_v4 = vld [vmem:[#allocation5 + $0x98] sm:$0xff]  }
 0x263   : > { %v2934_v25 = vpop.f32.mrf.mxu1 }
 0x264   : > { %v590_v26 = vmax.f32 %v581_v24, 0.0  ;;  %2957 = vmatmul.mubr.bf16.gmra.mxu0 %v592_v23  ;;  %v885_v24 = vrot.slane %v3816_v3, %v884_v16 }
 0x265   : > { %v583_v27 = vpop.f32.mrf.mxu1  ;;  %2960 = vmatprep.mubr.msk.bf16.mxu0 %vm3580_vm0, %v3579_v1 }
 0x266   : > { %v593_v29 = vpack.c.bf16 %v590_v26, %v590_v26 }
 0x267   : > { %v2935_v28 = vpop.f32.mrf.mxu1 }
 0x26c   : > { %2961 = vmatmul.mubr.bf16.gmra.mxu0 %v593_v29 }
 0x26d   : > { %2987 = vmatprep.mubr.msk.f32.mxu0 %vm3580_vm0, %v3579_v1 }
 0x31c   : > { %v680_v30 = vpop.f32.mrf.mxu0 }
 0x31d   : > { %v3847_v55 = vadd.f32 %v680_v30, %v597_v44 }
 0x31e   : > { %v2954_v31 = vpop.f32.mrf.mxu0 }
 0x31f   : > { %v775_v58 = vmul.f32 %v3847_v55, %v3847_v55 }
 0x320   : > { %v683_v32 = vpop.f32.mrf.mxu0 }
 0x321   : > { %v3840_v52 = vadd.f32 %v683_v32, %v597_v44 }
 0x322   : > { %v2955_v33 = vpop.f32.mrf.mxu0 }
 0x323   : > { %v776_v57 = vmul.f32 %v3840_v52, %v3840_v52 }
 0x324   : > { %v688_v34 = vpop.f32.mrf.mxu0 }
 0x325   : > { %v3834_v49 = vadd.f32 %v688_v34, %v597_v44 }
 0x326   : > { %v2958_v35 = vpop.f32.mrf.mxu0 }
 0x327   : > { %v777_v56 = vmul.f32 %v3834_v49, %v3834_v49 }
 0x328   : > { %v691_v42 = vpop.f32.mrf.mxu0 }
 0x329   : > { %v3830_v46 = vadd.f32 %v691_v42, %v597_v44 }
 0x32a   : > { %v2959_v43 = vpop.f32.mrf.mxu0 }
 0x32b   : > { %v778_v53 = vmul.f32 %v3830_v46, %v3830_v46 }
 0x32c   : > { %v696_v45 = vpop.f32.mrf.mxu0 }
 0x32d   : > { %v3832_v47 = vadd.f32 %v696_v45, %v597_v44 }
 0x32e   : > { %v2962_v48 = vpop.f32.mrf.mxu0 }
 0x32f   : > { %v779_v50 = vmul.f32 %v3832_v47, %v3832_v47  ;;  %2965 = vmatpush3.msra.mxu1 %v3832_v47 }
 0x330   : > { %v699_v51 = vpop.f32.mrf.mxu0  ;;  %2966 = vmatprep.subr.mxu1 %v3579_v1 }
 0x331   : > { %2967 = vmatpush3.msra.mxu1 %v3830_v46  ;;  %2978 = vmatpush3.msra.mxu0 %v779_v50 }
 0x332   : > { %v2963_v54 = vpop.f32.mrf.mxu0  ;;  %2968 = vmatprep.subr.mxu1 %v3579_v1  ;;  %2979 = vmatprep.subr.mxu0 %v3579_v1 }
 0x333   : > { %2969 = vmatpush3.msra.mxu1 %v3834_v49  ;;  %2980 = vmatpush3.msra.mxu0 %v778_v53  ;;  %v3389_v53 = vld [vmem:[#allocation5 + $0x80] sm:$0xff]   ;;  %v3390_v54 = vld [vmem:[#allocation5 + $0xf8] sm:$0xff]  }
 0x334   : > { %2970 = vmatprep.subr.mxu1 %v3579_v1  ;;  %2981 = vmatprep.subr.mxu0 %v3579_v1 }
 0x335   : > { %2971 = vmatpush3.msra.mxu1 %v3840_v52  ;;  %2982 = vmatpush3.msra.mxu0 %v777_v56  ;;  %v3392_v56 = vld [vmem:[#allocation5 + $0xe8] sm:$0xff]  }
 0x336   : > { %2972 = vmatprep.subr.mxu1 %v3579_v1  ;;  %2983 = vmatprep.subr.mxu0 %v3579_v1 }
 0x337   : > { %2973 = vmatpush3.msra.mxu1 %v3847_v55  ;;  %2984 = vmatpush3.msra.mxu0 %v776_v57  ;;  %v3393_v57 = vld [vmem:[#allocation5 + $0xe0] sm:$0xff]  }
 0x338   : > { %2975 = vmatmul.mubr.msk.f32.vlgmr.msra.gmra.mxu1 %vm369_vm2, %v3581_v59  ;;  %2985 = vmatprep.subr.mxu0 %v3579_v1 }
 0x339   : > { %2986 = vmatpush3.msra.mxu0 %v775_v58  ;;  %2990 = vmatprep.subr.mxu1 %v3579_v1  ;;  %v3394_v58 = vld [vmem:[#allocation5 + $0xd8] sm:$0xff]  }
 0x33a   : > { %2988 = vmatmul.mubr.msk.f32.vlgmr.msra.gmra.mxu0 %vm369_vm2, %v3581_v59  ;;  %3000 = vmatprep.mubr.msk.f32.mxu1 %vm3580_vm0, %v3579_v1 }
 0x33b   : > { %3015 = vmatprep.subr.bf16.mxu0 %v3579_v1  ;;  %3031 = vmatprep.mubr.msk.bf16.mxu0 %vm3580_vm0, %v3579_v1 }
 0x33c   : > { %3016 = vmatpush3.bf16.msra.mxu0 %v3382_v60 }
 0x33d   : > { %3017 = vmatprep.subr.bf16.mxu0 %v3579_v1 }
 0x340   : > { %3018 = vmatpush3.bf16.msra.mxu0 %v3383_v61 }
 0x341   : > { %3019 = vmatprep.subr.bf16.mxu0 %v3579_v1 }
 0x344   : > { %3020 = vmatpush3.bf16.msra.mxu0 %v3384_v62 }
 0x345   : > { %3021 = vmatprep.subr.bf16.mxu0 %v3579_v1 }
 0x348   : > { %3022 = vmatpush3.bf16.msra.mxu0 %v3385_v63 }
 0x349   : > { %3023 = vmatprep.subr.bf16.mxu0 %v3579_v1 }
 0x34c   : > { %3024 = vmatpush3.bf16.msra.mxu0 %v3386_v4 }
 0x34d   : > { %3025 = vmatprep.subr.bf16.mxu0 %v3579_v1 }
 0x350   : > { %3026 = vmatpush3.bf16.msra.mxu0 %v3387_v5 }
 0x351   : > { %3027 = vmatprep.subr.bf16.mxu0 %v3579_v1 }
 0x3f8   : > { %v771_v6 = vpop.f32.mrf.mxu1 }
 0x3f9   : > { %v850_v7 = vmul.f32 %v771_v6, %v771_v6  ;;  %v856_v14 = vrot.slane %v771_v6, %v3811_v2 }
 0x3fa   : > { %v2976_v8 = vpop.f32.mrf.mxu1  ;;  %v846_v9 = vpop.f32.mrf.mxu0 }
 0x3fb   : > { %v851_v10 = vsub.f32 %v846_v9, %v850_v7  ;;  %v861_v18 = vsub.f32 %v3832_v47, %v856_v14  ;;  %v860_v21 = vsub.f32 %v3830_v46, %v856_v14  ;;  %v859_v22 = vsub.f32 %v3834_v49, %v856_v14 }
 0x3fc   : > { %v2989_v11 = vpop.f32.mrf.mxu0  ;;  %v858_v23 = vsub.f32 %v3840_v52, %v856_v14  ;;  %v857_v25 = vsub.f32 %v3847_v55, %v856_v14  ;;  %v3388_v52 = vld [vmem:[#allocation5 + $0x88] sm:$0xff]   ;;  %v3391_v55 = vld [vmem:[#allocation5 + $0xf0] sm:$0xff]  }
 0x3fd   : > { %v852_v12 = vmax.f32 %v851_v10, 0.0  ;;  %3028 = vmatpush3.bf16.msra.mxu0 %v3388_v52  ;;  %v3396_v14 = vld [vmem:[#allocation5 + $0xc8] sm:$0xff]  }
 0x3fe   : > { %3029 = vmatprep.subr.bf16.mxu0 %v3579_v1 }
 0x3ff   : > { %v862_v13 = vadd.f32 1e-05, %v852_v12 }
 0x401   : > { %3446 = vrsqrt.f32 %v862_v13  ;;  %3030 = vmatpush3.bf16.msra.mxu0 %v3389_v53  ;;  %v3395_v13 = vld [vmem:[#allocation5 + $0xd0] sm:$0xff]  }
 0x402   : > { %3071 = vmatprep.subr.mxu0 %v3579_v1 }
 0x40e   : > { %v3447_v17 = vpop.eup %3446 }
 0x40f   : > { %v867_v20 = vrot.slane %v3447_v17, %v3811_v2  ;;  %v3397_v17 = vld [vmem:[#allocation5 + $0xc0] sm:$0xff]  }
 0x411   : > { %v872_v26 = vmul.f32 %v867_v20, %v861_v18  ;;  %v871_v27 = vmul.f32 %v867_v20, %v860_v21  ;;  %v870_v28 = vmul.f32 %v867_v20, %v859_v22  ;;  %v869_v29 = vmul.f32 %v867_v20, %v858_v23 }
 0x412   : > { %v868_v33 = vmul.f32 %v867_v20, %v857_v25  ;;  %v1025_v18 = vsub.s32 4, %v3808_v0 }
 0x413   : > { %v881_v30 = vmul.f32 %v876_v19, %v872_v26  ;;  %v880_v31 = vmul.f32 %v876_v19, %v871_v27  ;;  %v879_v32 = vmul.f32 %v876_v19, %v870_v28  ;;  %v878_v42 = vmul.f32 %v876_v19, %v869_v29 }
 0x414   : > { %v877_v45 = vmul.f32 %v876_v19, %v868_v33  ;;  %v1026_v19 = vrot.slane %v3816_v3, %v1025_v18 }
 0x415   : > { %v890_v34 = vadd.f32 %v885_v24, %v881_v30  ;;  %v889_v35 = vadd.f32 %v885_v24, %v880_v31  ;;  %v888_v44 = vadd.f32 %v885_v24, %v879_v32  ;;  %v887_v47 = vadd.f32 %v885_v24, %v878_v42 }
 0x416   : > { %v886_v49 = vadd.f32 %v885_v24, %v877_v45 }
 0x417   : > { %v895_v43 = vmax.f32 %v890_v34, 0.0  ;;  %v894_v46 = vmax.f32 %v889_v35, 0.0  ;;  %v893_v48 = vmax.f32 %v888_v44, 0.0  ;;  %v892_v50 = vmax.f32 %v887_v47, 0.0 }
 0x418   : > { %v891_v51 = vmax.f32 %v886_v49, 0.0 }
 0x419   : > { %2991 = vmatpush3.msra.mxu1 %v895_v43 }
 0x41a   : > { %2992 = vmatprep.subr.mxu1 %v3579_v1 }
 0x41b   : > { %2993 = vmatpush3.msra.mxu1 %v894_v46 }
 0x41c   : > { %2994 = vmatprep.subr.mxu1 %v3579_v1 }
 0x41d   : > { %2995 = vmatpush3.msra.mxu1 %v893_v48 }
 0x41e   : > { %2996 = vmatprep.subr.mxu1 %v3579_v1 }
 0x41f   : > { %2997 = vmatpush3.msra.mxu1 %v892_v50 }
 0x420   : > { %2998 = vmatprep.subr.mxu1 %v3579_v1 }
 0x421   : > { %2999 = vmatpush3.msra.mxu1 %v891_v51 }
 0x422   : > { %3001 = vmatmul.mubr.msk.f32.vlgmr.msra.gmra.mxu1 %vm369_vm2, %v3747_v36  ;;  %3043 = vmatprep.subr.bf16.mxu1 %v3579_v1 }
 0x423   : > { %3003 = vmatprep.mubr.msk.f32.mxu1 %vm3580_vm0, %v3579_v1  ;;  %3044 = vmatpush3.bf16.msra.mxu1 %v3390_v54 }
 0x424   : > { %3045 = vmatprep.subr.bf16.mxu1 %v3579_v1 }
 0x426   : > { %3004 = vmatmul.mubr.msk.f32.gmra.mxu1 %vm369_vm2, %v3758_v37 }
 0x427   : > { %3006 = vmatprep.mubr.msk.f32.mxu1 %vm3580_vm0, %v3579_v1  ;;  %3046 = vmatpush3.bf16.msra.mxu1 %v3391_v55 }
 0x428   : > { %3047 = vmatprep.subr.bf16.mxu1 %v3579_v1 }
 0x42a   : > { %3007 = vmatmul.mubr.msk.f32.gmra.mxu1 %vm369_vm2, %v3767_v38 }
 0x42b   : > { %3009 = vmatprep.mubr.msk.f32.mxu1 %vm3580_vm0, %v3579_v1  ;;  %3048 = vmatpush3.bf16.msra.mxu1 %v3392_v56 }
 0x42c   : > { %3049 = vmatprep.subr.bf16.mxu1 %v3579_v1 }
 0x42e   : > { %3010 = vmatmul.mubr.msk.f32.gmra.mxu1 %vm369_vm2, %v3776_v39 }
 0x42f   : > { %3012 = vmatprep.mubr.msk.f32.mxu1 %vm3580_vm0, %v3579_v1  ;;  %3050 = vmatpush3.bf16.msra.mxu1 %v3393_v57  ;;  %v1141_v57 = vsub.s32 5, %v3808_v0 }
 0x430   : > { %3051 = vmatprep.subr.bf16.mxu1 %v3579_v1 }
 0x432   : > { %3013 = vmatmul.mubr.msk.f32.gmra.mxu1 %vm369_vm2, %v3785_v40 }
 0x433   : > { %3059 = vmatprep.mubr.msk.bf16.mxu1 %vm3580_vm0, %v3579_v1  ;;  %3052 = vmatpush3.bf16.msra.mxu1 %v3394_v58 }
 0x434   : > { %3053 = vmatprep.subr.bf16.mxu1 %v3579_v1 }
 0x437   : > { %3054 = vmatpush3.bf16.msra.mxu1 %v3395_v13 }
 0x438   : > { %3055 = vmatprep.subr.bf16.mxu1 %v3579_v1 }
 0x43b   : > { %3056 = vmatpush3.bf16.msra.mxu1 %v3396_v14 }
 0x43c   : > { %3057 = vmatprep.subr.bf16.mxu1 %v3579_v1 }
 0x43f   : > { %3058 = vmatpush3.bf16.msra.mxu1 %v3397_v17 }
 0x440   : > { %3084 = vmatprep.subr.mxu1 %v3579_v1 }
 0x4e2   : > { %v996_v60 = vpop.f32.mrf.mxu1 }
 0x4e4   : > { %v3002_v61 = vpop.f32.mrf.mxu1 }
 0x4e5   : > { %v1142_v61 = vrot.slane %v3816_v3, %v1141_v57 }
 0x4e6   : > { %v1001_v62 = vpop.f32.mrf.mxu1 }
 0x4e7   : > { %v1020_v63 = vpack.c.bf16 %v1001_v62, %v996_v60 }
 0x4e8   : > { %v3005_v4 = vpop.f32.mrf.mxu1 }
 0x4e9   : > { %3032 = vmatmul.mubr.bf16.vlgmr.msra.gmra.mxu0 %v1020_v63 }
 0x4ea   : > { %v1006_v5 = vpop.f32.mrf.mxu1  ;;  %3035 = vmatprep.mubr.msk.bf16.mxu0 %vm3580_vm0, %v3579_v1 }
 0x4ec   : > { %v3008_v6 = vpop.f32.mrf.mxu1 }
 0x4ee   : > { %v1011_v7 = vpop.f32.mrf.mxu1 }
 0x4ef   : > { %v1021_v8 = vpack.c.bf16 %v1011_v7, %v1006_v5 }
 0x4f0   : > { %v3011_v9 = vpop.f32.mrf.mxu1 }
 0x4f1   : > { %3036 = vmatmul.mubr.bf16.gmra.mxu0 %v1021_v8 }
 0x4f2   : > { %v1016_v10 = vpop.f32.mrf.mxu1  ;;  %3039 = vmatprep.mubr.msk.bf16.mxu0 %vm3580_vm0, %v3579_v1 }
 0x4f3   : > { %v1022_v12 = vpack.c.bf16 %v1016_v10, %v1016_v10 }
 0x4f4   : > { %v3014_v11 = vpop.f32.mrf.mxu1 }
 0x4f9   : > { %3040 = vmatmul.mubr.bf16.gmra.mxu0 %v1022_v12 }
 0x4fa   : > { %3081 = vmatprep.mubr.msk.f32.mxu0 %vm3580_vm0, %v3579_v1 }
 0x5a9   : > { %v1109_v20 = vpop.f32.mrf.mxu0 }
 0x5aa   : > { %v1110_v22 = vadd.f32 %v1109_v20, %v1026_v19  ;;  %v3399_v20 = vld [vmem:[#allocation5 + $0x130] sm:$0xff]  }
 0x5ab   : > { %v3033_v21 = vpop.f32.mrf.mxu0 }
 0x5ac   : > { %v1131_v26 = vmax.f32 %v1110_v22, 0.0  ;;  %v3400_v21 = vld [vmem:[#allocation5 + $0x128] sm:$0xff]   ;;  %v3401_v22 = vld [vmem:[#allocation5 + $0x120] sm:$0xff]  }
 0x5ad   : > { %v1112_v23 = vpop.f32.mrf.mxu0 }
 0x5ae   : > { %v1113_v24 = vadd.f32 %v1112_v23, %v1026_v19  ;;  %v3402_v23 = vld [vmem:[#allocation5 + $0x118] sm:$0xff]  }
 0x5af   : > { %v3034_v25 = vpop.f32.mrf.mxu0 }
 0x5b0   : > { %v1132_v27 = vmax.f32 %v1113_v24, 0.0  ;;  %v3403_v24 = vld [vmem:[#allocation5 + $0x110] sm:$0xff]  }
 0x5b1   : > { %v1117_v28 = vpop.f32.mrf.mxu0 }
 0x5b2   : > { %v1136_v29 = vpack.c.bf16 %v1132_v27, %v1131_v26  ;;  %v1118_v31 = vadd.f32 %v1117_v28, %v1026_v19 }
 0x5b3   : > { %v3037_v30 = vpop.f32.mrf.mxu0 }
 0x5b4   : > { %3060 = vmatmul.mubr.bf16.vlgmr.msra.gmra.mxu1 %v1136_v29  ;;  %v1133_v35 = vmax.f32 %v1118_v31, 0.0 }
 0x5b5   : > { %v1120_v32 = vpop.f32.mrf.mxu0  ;;  %3063 = vmatprep.mubr.msk.bf16.mxu1 %vm3580_vm0, %v3579_v1 }
 0x5b6   : > { %v1121_v33 = vadd.f32 %v1120_v32, %v1026_v19 }
 0x5b7   : > { %v3038_v34 = vpop.f32.mrf.mxu0 }
 0x5b8   : > { %v1134_v42 = vmax.f32 %v1121_v33, 0.0  ;;  %v1417_v34 = vsub.s32 6, %v3808_v0 }
 0x5b9   : > { %v1125_v43 = vpop.f32.mrf.mxu0 }
 0x5ba   : > { %v1137_v44 = vpack.c.bf16 %v1134_v42, %v1133_v35  ;;  %v1126_v45 = vadd.f32 %v1125_v43, %v1026_v19  ;;  %v3398_v19 = vld [vmem:[#allocation5 + $0x138] sm:$0xff]   ;;  %v1426_v35 = vsub.s32 7, %v3808_v0 }
 0x5bb   : > { %v3041_v46 = vpop.f32.mrf.mxu0 }
 0x5bc   : > { %v1135_v47 = vmax.f32 %v1126_v45, 0.0  ;;  %3064 = vmatmul.mubr.bf16.gmra.mxu1 %v1137_v44  ;;  %v1418_v44 = vrot.slane %v3816_v3, %v1417_v34 }
 0x5bd   : > { %v1128_v48 = vpop.f32.mrf.mxu0  ;;  %3067 = vmatprep.mubr.msk.bf16.mxu1 %vm3580_vm0, %v3579_v1 }
 0x5be   : > { %v1138_v50 = vpack.c.bf16 %v1135_v47, %v1135_v47 }
 0x5bf   : > { %v3042_v49 = vpop.f32.mrf.mxu0 }
 0x5c0   : > { %v1427_v49 = vrot.slane %v3816_v3, %v1426_v35 }
 0x5c4   : > { %3068 = vmatmul.mubr.bf16.gmra.mxu1 %v1138_v50 }
 0x5c5   : > { %3094 = vmatprep.mubr.msk.f32.mxu1 %vm3580_vm0, %v3579_v1 }
 0x674   : > { %v1225_v51 = vpop.f32.mrf.mxu1 }
 0x675   : > { %v3966_v12 = vadd.f32 %v1225_v51, %v1142_v61 }
 0x676   : > { %v3061_v52 = vpop.f32.mrf.mxu1 }
 0x677   : > { %v1317_v17 = vmul.f32 %v3966_v12, %v3966_v12 }
 0x678   : > { %v1228_v53 = vpop.f32.mrf.mxu1 }
 0x679   : > { %v3959_v9 = vadd.f32 %v1228_v53, %v1142_v61 }
 0x67a   : > { %v3062_v54 = vpop.f32.mrf.mxu1 }
 0x67b   : > { %v1318_v14 = vmul.f32 %v3959_v9, %v3959_v9 }
 0x67c   : > { %v1233_v55 = vpop.f32.mrf.mxu1 }
 0x67d   : > { %v3953_v6 = vadd.f32 %v1233_v55, %v1142_v61 }
 0x67e   : > { %v3065_v56 = vpop.f32.mrf.mxu1 }
 0x67f   : > { %v1319_v13 = vmul.f32 %v3953_v6, %v3953_v6 }
 0x680   : > { %v1236_v58 = vpop.f32.mrf.mxu1 }
 0x681   : > { %v3949_v63 = vadd.f32 %v1236_v58, %v1142_v61 }
 0x682   : > { %v3066_v60 = vpop.f32.mrf.mxu1 }
 0x683   : > { %v1320_v10 = vmul.f32 %v3949_v63, %v3949_v63 }
 0x684   : > { %v1241_v62 = vpop.f32.mrf.mxu1 }
 0x685   : > { %v3951_v4 = vadd.f32 %v1241_v62, %v1142_v61 }
 0x686   : > { %v3069_v5 = vpop.f32.mrf.mxu1 }
 0x687   : > { %v1321_v7 = vmul.f32 %v3951_v4, %v3951_v4  ;;  %3072 = vmatpush3.msra.mxu0 %v3951_v4 }
 0x688   : > { %v1244_v8 = vpop.f32.mrf.mxu1  ;;  %3073 = vmatprep.subr.mxu0 %v3579_v1 }
 0x689   : > { %3074 = vmatpush3.msra.mxu0 %v3949_v63  ;;  %3085 = vmatpush3.msra.mxu1 %v1321_v7 }
 0x68a   : > { %v3070_v11 = vpop.f32.mrf.mxu1  ;;  %3075 = vmatprep.subr.mxu0 %v3579_v1  ;;  %3086 = vmatprep.subr.mxu1 %v3579_v1 }
 0x68b   : > { %3076 = vmatpush3.msra.mxu0 %v3953_v6  ;;  %3087 = vmatpush3.msra.mxu1 %v1320_v10 }
 0x68c   : > { %3077 = vmatprep.subr.mxu0 %v3579_v1  ;;  %3088 = vmatprep.subr.mxu1 %v3579_v1 }
 0x68d   : > { %3078 = vmatpush3.msra.mxu0 %v3959_v9  ;;  %3089 = vmatpush3.msra.mxu1 %v1319_v13  ;;  %v3410_v13 = vld [vmem:[#allocation5 + $0x158] sm:$0xff]  }
 0x68e   : > { %3079 = vmatprep.subr.mxu0 %v3579_v1  ;;  %3090 = vmatprep.subr.mxu1 %v3579_v1 }
 0x68f   : > { %3080 = vmatpush3.msra.mxu0 %v3966_v12  ;;  %3091 = vmatpush3.msra.mxu1 %v1318_v14 }
 0x690   : > { %3082 = vmatmul.mubr.msk.f32.vlgmr.msra.gmra.mxu0 %vm369_vm2, %v3581_v59  ;;  %3092 = vmatprep.subr.mxu1 %v3579_v1 }
 0x691   : > { %3093 = vmatpush3.msra.mxu1 %v1317_v17  ;;  %3097 = vmatprep.subr.mxu0 %v3579_v1 }
 0x692   : > { %3095 = vmatmul.mubr.msk.f32.vlgmr.msra.gmra.mxu1 %vm369_vm2, %v3581_v59  ;;  %3107 = vmatprep.mubr.msk.f32.mxu0 %vm3580_vm0, %v3579_v1 }
 0x693   : > { %3122 = vmatprep.subr.bf16.mxu1 %v3579_v1  ;;  %3138 = vmatprep.mubr.msk.bf16.mxu1 %vm3580_vm0, %v3579_v1 }
 0x694   : > { %3123 = vmatpush3.bf16.msra.mxu1 %v3398_v19 }
 0x695   : > { %3124 = vmatprep.subr.bf16.mxu1 %v3579_v1 }
 0x698   : > { %3125 = vmatpush3.bf16.msra.mxu1 %v3399_v20 }
 0x699   : > { %3126 = vmatprep.subr.bf16.mxu1 %v3579_v1 }
 0x69c   : > { %3127 = vmatpush3.bf16.msra.mxu1 %v3400_v21 }
 0x69d   : > { %3128 = vmatprep.subr.bf16.mxu1 %v3579_v1 }
 0x6a0   : > { %3129 = vmatpush3.bf16.msra.mxu1 %v3401_v22 }
 0x6a1   : > { %3130 = vmatprep.subr.bf16.mxu1 %v3579_v1 }
 0x6a4   : > { %3131 = vmatpush3.bf16.msra.mxu1 %v3402_v23 }
 0x6a5   : > { %3132 = vmatprep.subr.bf16.mxu1 %v3579_v1 }
 0x6a8   : > { %3133 = vmatpush3.bf16.msra.mxu1 %v3403_v24 }
 0x6a9   : > { %3134 = vmatprep.subr.bf16.mxu1 %v3579_v1 }
 0x750   : > { %v1313_v25 = vpop.f32.mrf.mxu0 }
 0x751   : > { %v1392_v26 = vmul.f32 %v1313_v25, %v1313_v25  ;;  %v1398_v33 = vrot.slane %v1313_v25, %v3811_v2 }
 0x752   : > { %v3083_v27 = vpop.f32.mrf.mxu0  ;;  %v1388_v28 = vpop.f32.mrf.mxu1 }
 0x753   : > { %v1393_v29 = vsub.f32 %v1388_v28, %v1392_v26  ;;  %v1403_v43 = vsub.f32 %v3951_v4, %v1398_v33  ;;  %v1402_v46 = vsub.f32 %v3949_v63, %v1398_v33  ;;  %v1401_v47 = vsub.f32 %v3953_v6, %v1398_v33 }
 0x754   : > { %v3096_v30 = vpop.f32.mrf.mxu1  ;;  %v1400_v48 = vsub.f32 %v3959_v9, %v1398_v33  ;;  %v1399_v50 = vsub.f32 %v3966_v12, %v1398_v33  ;;  %v3408_v12 = vld [vmem:[#allocation5 + $0x168] sm:$0xff]   ;;  %v4057_v33 = vld [vmem:[%s4231_s5 + $0x8] sm:$0xff] }
 0x755   : > { %v1394_v31 = vmax.f32 %v1393_v29, 0.0  ;;  %v3411_v30 = vld [vmem:[#allocation5 + $0x150] sm:$0xff]  }
 0x757   : > { %v1404_v32 = vadd.f32 1e-05, %v1394_v31  ;;  %v3412_v31 = vld [vmem:[#allocation5 + $0x148] sm:$0xff]  }
 0x759   : > { %3448 = vrsqrt.f32 %v1404_v32  ;;  %v3413_v32 = vld [vmem:[#allocation5 + $0x140] sm:$0xff]  }
 0x766   : > { %v3449_v42 = vpop.eup %3448 }
 0x767   : > { %v1409_v45 = vrot.slane %v3449_v42, %v3811_v2  ;;  %v1568_v42 = vrot.slane %v4057_v33, %v3811_v2 }
 0x769   : > { %v1414_v51 = vmul.f32 %v1409_v45, %v1403_v43  ;;  %v1413_v52 = vmul.f32 %v1409_v45, %v1402_v46  ;;  %v1412_v53 = vmul.f32 %v1409_v45, %v1401_v47  ;;  %v1411_v54 = vmul.f32 %v1409_v45, %v1400_v48 }
 0x76a   : > { %v1410_v60 = vmul.f32 %v1409_v45, %v1399_v50 }
 0x76b   : > { %v1423_v55 = vmul.f32 %v1418_v44, %v1414_v51  ;;  %v1422_v56 = vmul.f32 %v1418_v44, %v1413_v52  ;;  %v1421_v58 = vmul.f32 %v1418_v44, %v1412_v53  ;;  %v1420_v63 = vmul.f32 %v1418_v44, %v1411_v54 }
 0x76c   : > { %v1419_v6 = vmul.f32 %v1418_v44, %v1410_v60 }
 0x76d   : > { %v1432_v61 = vadd.f32 %v1427_v49, %v1423_v55  ;;  %v1431_v62 = vadd.f32 %v1427_v49, %v1422_v56  ;;  %v1430_v5 = vadd.f32 %v1427_v49, %v1421_v58  ;;  %v1429_v8 = vadd.f32 %v1427_v49, %v1420_v63 }
 0x76e   : > { %v1428_v9 = vadd.f32 %v1427_v49, %v1419_v6 }
 0x76f   : > { %v1437_v4 = vmax.f32 %v1432_v61, 0.0  ;;  %v1436_v7 = vmax.f32 %v1431_v62, 0.0  ;;  %v1435_v3 = vmax.f32 %v1430_v5, 0.0  ;;  %v1434_v10 = vmax.f32 %v1429_v8, 0.0 }
 0x770   : > { %v1433_v11 = vmax.f32 %v1428_v9, 0.0 }
 0x771   : > { %3098 = vmatpush3.msra.mxu0 %v1437_v4 }
 0x772   : > { %3099 = vmatprep.subr.mxu0 %v3579_v1 }
 0x773   : > { %3100 = vmatpush3.msra.mxu0 %v1436_v7 }
 0x774   : > { %3101 = vmatprep.subr.mxu0 %v3579_v1 }
 0x775   : > { %3102 = vmatpush3.msra.mxu0 %v1435_v3 }
 0x776   : > { %3103 = vmatprep.subr.mxu0 %v3579_v1 }
 0x777   : > { %3104 = vmatpush3.msra.mxu0 %v1434_v10 }
 0x778   : > { %3105 = vmatprep.subr.mxu0 %v3579_v1 }
 0x779   : > { %3106 = vmatpush3.msra.mxu0 %v1433_v11 }
 0x77a   : > { %3108 = vmatmul.mubr.msk.f32.vlgmr.msra.gmra.mxu0 %vm369_vm2, %v3747_v36  ;;  %3150 = vmatprep.subr.bf16.mxu0 %v3579_v1  ;;  %v3404_v36 = vld [vmem:[#allocation5 + $0x108] sm:$0xff]  }
 0x77b   : > { %3110 = vmatprep.mubr.msk.f32.mxu0 %vm3580_vm0, %v3579_v1  ;;  %3135 = vmatpush3.bf16.msra.mxu1 %v3404_v36 }
 0x77c   : > { %3136 = vmatprep.subr.bf16.mxu1 %v3579_v1 }
 0x77e   : > { %3111 = vmatmul.mubr.msk.f32.gmra.mxu0 %vm369_vm2, %v3758_v37  ;;  %v3405_v37 = vld [vmem:[#allocation5 + $0x100] sm:$0xff]  }
 0x77f   : > { %3113 = vmatprep.mubr.msk.f32.mxu0 %vm3580_vm0, %v3579_v1  ;;  %3137 = vmatpush3.bf16.msra.mxu1 %v3405_v37 }
 0x780   : > { %3178 = vmatprep.subr.mxu1 %v3579_v1 }
 0x782   : > { %3114 = vmatmul.mubr.msk.f32.gmra.mxu0 %vm369_vm2, %v3767_v38  ;;  %v3406_v38 = vld [vmem:[#allocation5 + $0x178] sm:$0xff]  }
 0x783   : > { %3116 = vmatprep.mubr.msk.f32.mxu0 %vm3580_vm0, %v3579_v1  ;;  %3151 = vmatpush3.bf16.msra.mxu0 %v3406_v38 }
 0x784   : > { %3152 = vmatprep.subr.bf16.mxu0 %v3579_v1 }
 0x786   : > { %3117 = vmatmul.mubr.msk.f32.gmra.mxu0 %vm369_vm2, %v3776_v39  ;;  %v3407_v39 = vld [vmem:[#allocation5 + $0x170] sm:$0xff]  }
 0x787   : > { %3119 = vmatprep.mubr.msk.f32.mxu0 %vm3580_vm0, %v3579_v1  ;;  %3153 = vmatpush3.bf16.msra.mxu0 %v3407_v39 }
 0x788   : > { %3154 = vmatprep.subr.bf16.mxu0 %v3579_v1 }
 0x78a   : > { %3120 = vmatmul.mubr.msk.f32.gmra.mxu0 %vm369_vm2, %v3785_v40  ;;  %v3409_v40 = vld [vmem:[#allocation5 + $0x160] sm:$0xff]  }
 0x78b   : > { %3166 = vmatprep.mubr.msk.bf16.mxu0 %vm3580_vm0, %v3579_v1  ;;  %3155 = vmatpush3.bf16.msra.mxu0 %v3408_v12 }
 0x78c   : > { %3156 = vmatprep.subr.bf16.mxu0 %v3579_v1 }
 0x78f   : > { %3157 = vmatpush3.bf16.msra.mxu0 %v3409_v40  ;;  %v1684_v40 = vrot.slane %v4057_v33, %v596_v41 }
 0x790   : > { %3158 = vmatprep.subr.bf16.mxu0 %v3579_v1 }
 0x793   : > { %3159 = vmatpush3.bf16.msra.mxu0 %v3410_v13 }
 0x794   : > { %3160 = vmatprep.subr.bf16.mxu0 %v3579_v1 }
 0x797   : > { %3161 = vmatpush3.bf16.msra.mxu0 %v3411_v30  ;;  %v3415_v30 = vld [vmem:[#allocation5 + $0x1b0] sm:$0xff]  }
 0x798   : > { %3162 = vmatprep.subr.bf16.mxu0 %v3579_v1 }
 0x79b   : > { %3163 = vmatpush3.bf16.msra.mxu0 %v3412_v31  ;;  %v3416_v31 = vld [vmem:[#allocation5 + $0x1a8] sm:$0xff]  }
 0x79c   : > { %3164 = vmatprep.subr.bf16.mxu0 %v3579_v1 }
 0x79f   : > { %3165 = vmatpush3.bf16.msra.mxu0 %v3413_v32  ;;  %v3417_v32 = vld [vmem:[#allocation5 + $0x1a0] sm:$0xff]  }
 0x7a0   : > { %3191 = vmatprep.subr.mxu0 %v3579_v1 }
 0x83a   : > { %v1538_v14 = vpop.f32.mrf.mxu0 }
 0x83c   : > { %v3109_v17 = vpop.f32.mrf.mxu0 }
 0x83e   : > { %v1543_v19 = vpop.f32.mrf.mxu0 }
 0x83f   : > { %v1562_v20 = vpack.c.bf16 %v1543_v19, %v1538_v14 }
 0x840   : > { %v3112_v21 = vpop.f32.mrf.mxu0 }
 0x841   : > { %3139 = vmatmul.mubr.bf16.vlgmr.msra.gmra.mxu1 %v1562_v20 }
 0x842   : > { %v1548_v22 = vpop.f32.mrf.mxu0  ;;  %3142 = vmatprep.mubr.msk.bf16.mxu1 %vm3580_vm0, %v3579_v1 }
 0x844   : > { %v3115_v23 = vpop.f32.mrf.mxu0 }
 0x846   : > { %v1553_v24 = vpop.f32.mrf.mxu0 }
 0x847   : > { %v1563_v25 = vpack.c.bf16 %v1553_v24, %v1548_v22 }
 0x848   : > { %v3118_v26 = vpop.f32.mrf.mxu0 }
 0x849   : > { %3143 = vmatmul.mubr.bf16.gmra.mxu1 %v1563_v25 }
 0x84a   : > { %v1558_v27 = vpop.f32.mrf.mxu0  ;;  %3146 = vmatprep.mubr.msk.bf16.mxu1 %vm3580_vm0, %v3579_v1 }
 0x84b   : > { %v1564_v29 = vpack.c.bf16 %v1558_v27, %v1558_v27 }
 0x84c   : > { %v3121_v28 = vpop.f32.mrf.mxu0 }
 0x851   : > { %3147 = vmatmul.mubr.bf16.gmra.mxu1 %v1564_v29  ;;  %v3414_v29 = vld [vmem:[#allocation5 + $0x1b8] sm:$0xff]  }
 0x852   : > { %3188 = vmatprep.mubr.msk.f32.mxu1 %vm3580_vm0, %v3579_v1 }
 0x901   : > { %v1651_v43 = vpop.f32.mrf.mxu1 }
 0x902   : > { %v1652_v45 = vadd.f32 %v1651_v43, %v1568_v42  ;;  %v3420_v43 = vld [vmem:[#allocation5 + $0x188] sm:$0xff]  }
 0x903   : > { %v3140_v44 = vpop.f32.mrf.mxu1 }
 0x904   : > { %v1673_v49 = vmax.f32 %v1652_v45, 0.0 }
 0x905   : > { %v1654_v46 = vpop.f32.mrf.mxu1 }
 0x906   : > { %v1655_v47 = vadd.f32 %v1654_v46, %v1568_v42 }
 0x907   : > { %v3141_v48 = vpop.f32.mrf.mxu1 }
 0x908   : > { %v1674_v50 = vmax.f32 %v1655_v47, 0.0 }
 0x909   : > { %v1659_v51 = vpop.f32.mrf.mxu1 }
 0x90a   : > { %v1678_v52 = vpack.c.bf16 %v1674_v50, %v1673_v49  ;;  %v1660_v54 = vadd.f32 %v1659_v51, %v1568_v42 }
 0x90b   : > { %v3144_v53 = vpop.f32.mrf.mxu1 }
 0x90c   : > { %3167 = vmatmul.mubr.bf16.vlgmr.msra.gmra.mxu0 %v1678_v52  ;;  %v1675_v60 = vmax.f32 %v1660_v54, 0.0 }
 0x90d   : > { %v1662_v55 = vpop.f32.mrf.mxu1  ;;  %3170 = vmatprep.mubr.msk.bf16.mxu0 %vm3580_vm0, %v3579_v1 }
 0x90e   : > { %v1663_v56 = vadd.f32 %v1662_v55, %v1568_v42  ;;  %v1960_v55 = vrot.slane %v4057_v33, %v875_v15 }
 0x90f   : > { %v3145_v58 = vpop.f32.mrf.mxu1 }
 0x910   : > { %v1676_v61 = vmax.f32 %v1663_v56, 0.0 }
 0x911   : > { %v1667_v62 = vpop.f32.mrf.mxu1 }
 0x912   : > { %v1679_v63 = vpack.c.bf16 %v1676_v61, %v1675_v60  ;;  %v1668_v4 = vadd.f32 %v1667_v62, %v1568_v42  ;;  %v3419_v42 = vld [vmem:[#allocation5 + $0x190] sm:$0xff]   ;;  %v1969_v62 = vrot.slane %v4057_v33, %v884_v16 }
 0x913   : > { %v3148_v5 = vpop.f32.mrf.mxu1 }
 0x914   : > { %v1677_v6 = vmax.f32 %v1668_v4, 0.0  ;;  %3171 = vmatmul.mubr.bf16.gmra.mxu0 %v1679_v63 }
 0x915   : > { %v1670_v7 = vpop.f32.mrf.mxu1  ;;  %3174 = vmatprep.mubr.msk.bf16.mxu0 %vm3580_vm0, %v3579_v1 }
 0x916   : > { %v1680_v3 = vpack.c.bf16 %v1677_v6, %v1677_v6 }
 0x917   : > { %v3149_v8 = vpop.f32.mrf.mxu1 }
 0x91c   : > { %3175 = vmatmul.mubr.bf16.gmra.mxu0 %v1680_v3 }
 0x91d   : > { %3201 = vmatprep.mubr.msk.f32.mxu0 %vm3580_vm0, %v3579_v1 }
 0x9cc   : > { %v1767_v9 = vpop.f32.mrf.mxu0 }
 0x9cd   : > { %v4087_v25 = vadd.f32 %v1767_v9, %v1684_v40 }
 0x9ce   : > { %v3168_v10 = vpop.f32.mrf.mxu0 }
 0x9cf   : > { %v1859_v28 = vmul.f32 %v4087_v25, %v4087_v25 }
 0x9d0   : > { %v1770_v11 = vpop.f32.mrf.mxu0 }
 0x9d1   : > { %v4080_v23 = vadd.f32 %v1770_v11, %v1684_v40 }
 0x9d2   : > { %v3169_v36 = vpop.f32.mrf.mxu0 }
 0x9d3   : > { %v1860_v27 = vmul.f32 %v4080_v23, %v4080_v23 }
 0x9d4   : > { %v1775_v37 = vpop.f32.mrf.mxu0 }
 0x9d5   : > { %v4074_v20 = vadd.f32 %v1775_v37, %v1684_v40 }
 0x9d6   : > { %v3172_v38 = vpop.f32.mrf.mxu0 }
 0x9d7   : > { %v1861_v26 = vmul.f32 %v4074_v20, %v4074_v20 }
 0x9d8   : > { %v1778_v39 = vpop.f32.mrf.mxu0 }
 0x9d9   : > { %v4070_v14 = vadd.f32 %v1778_v39, %v1684_v40 }
 0x9da   : > { %v3173_v12 = vpop.f32.mrf.mxu0 }
 0x9db   : > { %v1862_v41 = vmul.f32 %v4070_v14, %v4070_v14 }
 0x9dc   : > { %v1783_v13 = vpop.f32.mrf.mxu0 }
 0x9dd   : > { %v4072_v17 = vadd.f32 %v1783_v13, %v1684_v40 }
 0x9de   : > { %v3176_v19 = vpop.f32.mrf.mxu0 }
 0x9df   : > { %v1863_v21 = vmul.f32 %v4072_v17, %v4072_v17  ;;  %3179 = vmatpush3.msra.mxu1 %v4072_v17  ;;  %v3421_v19 = vld [vmem:[#allocation5 + $0x180] sm:$0xff]  }
 0x9e0   : > { %v1786_v22 = vpop.f32.mrf.mxu0  ;;  %3180 = vmatprep.subr.mxu1 %v3579_v1 }
 0x9e1   : > { %3181 = vmatpush3.msra.mxu1 %v4070_v14  ;;  %3192 = vmatpush3.msra.mxu0 %v1863_v21  ;;  %v3423_v21 = vld [vmem:[#allocation5 + $0x1f0] sm:$0xff]   ;;  %v3424_v22 = vld [vmem:[#allocation5 + $0x1e8] sm:$0xff]  }
 0x9e2   : > { %v3177_v24 = vpop.f32.mrf.mxu0  ;;  %3182 = vmatprep.subr.mxu1 %v3579_v1  ;;  %3193 = vmatprep.subr.mxu0 %v3579_v1 }
 0x9e3   : > { %3183 = vmatpush3.msra.mxu1 %v4074_v20  ;;  %3194 = vmatpush3.msra.mxu0 %v1862_v41  ;;  %v3426_v41 = vld [vmem:[#allocation5 + $0x1d8] sm:$0xff]   ;;  %v3427_v24 = vld [vmem:[#allocation5 + $0x1d0] sm:$0xff]  }
 0x9e4   : > { %3184 = vmatprep.subr.mxu1 %v3579_v1  ;;  %3195 = vmatprep.subr.mxu0 %v3579_v1 }
 0x9e5   : > { %3185 = vmatpush3.msra.mxu1 %v4080_v23  ;;  %3196 = vmatpush3.msra.mxu0 %v1861_v26 }
 0x9e6   : > { %3186 = vmatprep.subr.mxu1 %v3579_v1  ;;  %3197 = vmatprep.subr.mxu0 %v3579_v1 }
 0x9e7   : > { %3187 = vmatpush3.msra.mxu1 %v4087_v25  ;;  %3198 = vmatpush3.msra.mxu0 %v1860_v27 }
 0x9e8   : > { %3189 = vmatmul.mubr.msk.f32.vlgmr.msra.gmra.mxu1 %vm369_vm2, %v3581_v59  ;;  %3199 = vmatprep.subr.mxu0 %v3579_v1 }
 0x9e9   : > { %3200 = vmatpush3.msra.mxu0 %v1859_v28  ;;  %3204 = vmatprep.subr.mxu1 %v3579_v1 }
 0x9ea   : > { %3202 = vmatmul.mubr.msk.f32.vlgmr.msra.gmra.mxu0 %vm369_vm2, %v3581_v59  ;;  %3214 = vmatprep.mubr.msk.f32.mxu1 %vm3580_vm0, %v3579_v1  ;;  %v3418_v59 = vld [vmem:[#allocation5 + $0x198] sm:$0xff]  }
 0x9eb   : > { %3217 = vmatprep.subr.bf16.mxu0 %v3579_v1  ;;  %3233 = vmatprep.mubr.msk.bf16.mxu0 %vm3580_vm0, %v3579_v1 }
 0x9ec   : > { %3218 = vmatpush3.bf16.msra.mxu0 %v3414_v29  ;;  %v3429_v29 = vld [vmem:[#allocation5 + $0x1c0] sm:$0xff]  }
 0x9ed   : > { %3219 = vmatprep.subr.bf16.mxu0 %v3579_v1 }
 0x9f0   : > { %3220 = vmatpush3.bf16.msra.mxu0 %v3415_v30  ;;  %v3430_v30 = vld [vmem:[#allocation5 + $0x238] sm:$0xff]  }
 0x9f1   : > { %3221 = vmatprep.subr.bf16.mxu0 %v3579_v1 }
 0x9f4   : > { %3222 = vmatpush3.bf16.msra.mxu0 %v3416_v31  ;;  %v3431_v31 = vld [vmem:[#allocation5 + $0x230] sm:$0xff]  }
 0x9f5   : > { %3223 = vmatprep.subr.bf16.mxu0 %v3579_v1 }
 0x9f8   : > { %3224 = vmatpush3.bf16.msra.mxu0 %v3417_v32  ;;  %v3432_v32 = vld [vmem:[#allocation5 + $0x228] sm:$0xff]  }
 0x9f9   : > { %3225 = vmatprep.subr.bf16.mxu0 %v3579_v1 }
 0x9fc   : > { %3226 = vmatpush3.bf16.msra.mxu0 %v3418_v59  ;;  %v3433_v59 = vld [vmem:[#allocation5 + $0x220] sm:$0xff]  }
 0x9fd   : > { %3227 = vmatprep.subr.bf16.mxu0 %v3579_v1 }
 0xa00   : > { %3228 = vmatpush3.bf16.msra.mxu0 %v3419_v42  ;;  %v3434_v42 = vld [vmem:[#allocation5 + $0x218] sm:$0xff]  }
 0xa01   : > { %3229 = vmatprep.subr.bf16.mxu0 %v3579_v1 }
 0xa04   : > { %3230 = vmatpush3.bf16.msra.mxu0 %v3420_v43  ;;  %v3435_v43 = vld [vmem:[#allocation5 + $0x210] sm:$0xff]  }
 0xa05   : > { %3231 = vmatprep.subr.bf16.mxu0 %v3579_v1 }
 0xa08   : > { %3232 = vmatpush3.bf16.msra.mxu0 %v3421_v19 }
 0xa09   : > { %3257 = vmatprep.subr.bf16.mxu0 %v3579_v1 }
 0xaa8   : > { %v1855_v44 = vpop.f32.mrf.mxu1 }
 0xaa9   : > { %v1934_v45 = vmul.f32 %v1855_v44, %v1855_v44  ;;  %v1940_v52 = vrot.slane %v1855_v44, %v3811_v2  ;;  %v2075_v44 = vrot.slane %v4057_v33, %v1025_v18  ;;  %v3440_v18 = vld [vmem:[#allocation5 + $0x268] sm:$0xff]  }
 0xaaa   : > { %v1930_v46 = vpop.f32.mrf.mxu0  ;;  %v3190_v47 = vpop.f32.mrf.mxu1 }
 0xaab   : > { %v1935_v48 = vsub.f32 %v1930_v46, %v1934_v45  ;;  %v1945_v54 = vsub.f32 %v4072_v17, %v1940_v52  ;;  %v1944_v58 = vsub.f32 %v4070_v14, %v1940_v52  ;;  %v1943_v60 = vsub.f32 %v4074_v20, %v1940_v52  ;;  %v1980_v17 = vld [vmem:[#allocation2] sm:$0xff] }
 0xaac   : > { %v3203_v49 = vpop.f32.mrf.mxu0  ;;  %v1942_v61 = vsub.f32 %v4080_v23, %v1940_v52  ;;  %v1941_v63 = vsub.f32 %v4087_v25, %v1940_v52  ;;  %v3422_v20 = vld [vmem:[#allocation5 + $0x1f8] sm:$0xff]   ;;  %v3425_v23 = vld [vmem:[#allocation5 + $0x1e0] sm:$0xff]   ;;  %v3428_v25 = vld [vmem:[#allocation5 + $0x1c8] sm:$0xff]  }
 0xaad   : > { %v1936_v50 = vmax.f32 %v1935_v48, 0.0  ;;  %v3437_v52 = vld [vmem:[#allocation5 + $0x200] sm:$0xff]  }
 0xaaf   : > { %v1946_v51 = vadd.f32 1e-05, %v1936_v50 }
 0xab1   : > { %3450 = vrsqrt.f32 %v1946_v51  ;;  %v3436_v51 = vld [vmem:[#allocation5 + $0x208] sm:$0xff]  }
 0xabe   : > { %v3451_v53 = vpop.eup %3450 }
 0xabf   : > { %v1951_v56 = vrot.slane %v3451_v53, %v3811_v2  ;;  %v3438_v53 = vld [vmem:[#allocation5 + $0x278] sm:$0xff]  }
 0xac1   : > { %v1956_v4 = vmul.f32 %v1951_v56, %v1945_v54  ;;  %v1955_v5 = vmul.f32 %v1951_v56, %v1944_v58  ;;  %v1954_v6 = vmul.f32 %v1951_v56, %v1943_v60  ;;  %v1953_v7 = vmul.f32 %v1951_v56, %v1942_v61  ;;  %v3439_v54 = vld [vmem:[#allocation5 + $0x270] sm:$0xff]  }
 0xac2   : > { %v1952_v2 = vmul.f32 %v1951_v56, %v1941_v63  ;;  %v3442_v56 = vld [vmem:[#allocation5 + $0x258] sm:$0xff]   ;;  %v3443_v58 = vld [vmem:[#allocation5 + $0x250] sm:$0xff]   ;;  %v2185_v60 = vrot.slane %v4057_v33, %v1141_v57  ;;  %v2296_v57 = vrot.slane %v4057_v33, %v1417_v34 }
 0xac3   : > { %v1965_v8 = vmul.f32 %v1960_v55, %v1956_v4  ;;  %v1964_v15 = vmul.f32 %v1960_v55, %v1955_v5  ;;  %v1963_v3 = vmul.f32 %v1960_v55, %v1954_v6  ;;  %v1962_v11 = vmul.f32 %v1960_v55, %v1953_v7 }
 0xac4   : > { %v1961_v38 = vmul.f32 %v1960_v55, %v1952_v2  ;;  %v3441_v55 = vld [vmem:[#allocation5 + $0x260] sm:$0xff]  }
 0xac5   : > { %v1974_v9 = vadd.f32 %v1969_v62, %v1965_v8  ;;  %v1973_v10 = vadd.f32 %v1969_v62, %v1964_v15  ;;  %v1972_v37 = vadd.f32 %v1969_v62, %v1963_v3  ;;  %v1971_v12 = vadd.f32 %v1969_v62, %v1962_v11  ;;  %v3444_v8 = vld [vmem:[#allocation5 + $0x248] sm:$0xff]   ;;  %v3445_v15 = vld [vmem:[#allocation5 + $0x240] sm:$0xff]  }
 0xac6   : > { %v1970_v40 = vadd.f32 %v1969_v62, %v1961_v38 }
 0xac7   : > { %v1979_v36 = vmax.f32 %v1974_v9, 0.0  ;;  %v1978_v39 = vmax.f32 %v1973_v10, 0.0  ;;  %v1977_v16 = vmax.f32 %v1972_v37, 0.0  ;;  %v1976_v13 = vmax.f32 %v1971_v12, 0.0 }
 0xac8   : > { %v1975_v14 = vmax.f32 %v1970_v40, 0.0 }
 0xac9   : > { %3205 = vmatpush3.msra.mxu1 %v1979_v36 }
 0xaca   : > { %3206 = vmatprep.subr.mxu1 %v3579_v1 }
 0xacb   : > { %3207 = vmatpush3.msra.mxu1 %v1978_v39 }
 0xacc   : > { %3208 = vmatprep.subr.mxu1 %v3579_v1 }
 0xacd   : > { %3209 = vmatpush3.msra.mxu1 %v1977_v16 }
 0xace   : > { %3210 = vmatprep.subr.mxu1 %v3579_v1 }
 0xacf   : > { %3211 = vmatpush3.msra.mxu1 %v1976_v13 }
 0xad0   : > { %3212 = vmatprep.subr.mxu1 %v3579_v1 }
 0xad1   : > { %3213 = vmatpush3.msra.mxu1 %v1975_v14 }
 0xad2   : > { %3215 = vmatmul.mubr.msk.f32.vlgmr.msra.gmra.mxu1 %vm369_vm2, %v1980_v17  ;;  %3237 = vmatprep.subr.bf16.mxu1 %v3579_v1 }
 0xad3   : > { %3253 = vmatprep.mubr.msk.bf16.mxu1 %vm3580_vm0, %v3579_v1  ;;  %3238 = vmatpush3.bf16.msra.mxu1 %v3422_v20 }
 0xad4   : > { %3239 = vmatprep.subr.bf16.mxu1 %v3579_v1 }
 0xad7   : > { %3240 = vmatpush3.bf16.msra.mxu1 %v3423_v21 }
 0xad8   : > { %3241 = vmatprep.subr.bf16.mxu1 %v3579_v1 }
 0xadb   : > { %3242 = vmatpush3.bf16.msra.mxu1 %v3424_v22 }
 0xadc   : > { %3243 = vmatprep.subr.bf16.mxu1 %v3579_v1 }
 0xadf   : > { %3244 = vmatpush3.bf16.msra.mxu1 %v3425_v23 }
 0xae0   : > { %3245 = vmatprep.subr.bf16.mxu1 %v3579_v1 }
 0xae3   : > { %3246 = vmatpush3.bf16.msra.mxu1 %v3426_v41 }
 0xae4   : > { %3247 = vmatprep.subr.bf16.mxu1 %v3579_v1 }
 0xae7   : > { %3248 = vmatpush3.bf16.msra.mxu1 %v3427_v24 }
 0xae8   : > { %3249 = vmatprep.subr.bf16.mxu1 %v3579_v1 }
 0xaeb   : > { %3250 = vmatpush3.bf16.msra.mxu1 %v3428_v25 }
 0xaec   : > { %3251 = vmatprep.subr.bf16.mxu1 %v3579_v1 }
 0xaef   : > { %3252 = vmatpush3.bf16.msra.mxu1 %v3429_v29 }
 0xaf0   : > { %3277 = vmatprep.subr.bf16.mxu1 %v3579_v1 }
 0xb92   : > { %v2050_v26 = vpop.f32.mrf.mxu1 }
 0xb93   : > { %v2054_v27 = vpack.c.bf16 %v2050_v26, %v2050_v26 }
 0xb94   : > { %v3216_v28 = vpop.f32.mrf.mxu1 }
 0xb95   : > { %3234 = vmatmul.mubr.bf16.vlgmr.msra.gmra.mxu0 %v2054_v27 }
 0xb96   : > { %3273 = vmatprep.mubr.msk.bf16.mxu0 %vm3580_vm0, %v3579_v1  ;;  %3258 = vmatpush3.bf16.msra.mxu0 %v3430_v30 }
 0xb97   : > { %3259 = vmatprep.subr.bf16.mxu0 %v3579_v1 }
 0xb9a   : > { %3260 = vmatpush3.bf16.msra.mxu0 %v3431_v31 }
 0xb9b   : > { %3261 = vmatprep.subr.bf16.mxu0 %v3579_v1 }
 0xb9e   : > { %3262 = vmatpush3.bf16.msra.mxu0 %v3432_v32 }
 0xb9f   : > { %3263 = vmatprep.subr.bf16.mxu0 %v3579_v1 }
 0xba2   : > { %3264 = vmatpush3.bf16.msra.mxu0 %v3433_v59 }
 0xba3   : > { %3265 = vmatprep.subr.bf16.mxu0 %v3579_v1 }
 0xba6   : > { %3266 = vmatpush3.bf16.msra.mxu0 %v3434_v42 }
 0xba7   : > { %3267 = vmatprep.subr.bf16.mxu0 %v3579_v1 }
 0xbaa   : > { %3268 = vmatpush3.bf16.msra.mxu0 %v3435_v43 }
 0xbab   : > { %3269 = vmatprep.subr.bf16.mxu0 %v3579_v1 }
 0xbae   : > { %3270 = vmatpush3.bf16.msra.mxu0 %v3436_v51 }
 0xbaf   : > { %3271 = vmatprep.subr.bf16.mxu0 %v3579_v1 }
 0xbb2   : > { %3272 = vmatpush3.bf16.msra.mxu0 %v3437_v52 }
 0xc55   : > { %v2158_v45 = vpop.f32.mrf.mxu0 }
 0xc56   : > { %v2159_v46 = vadd.f32 %v2158_v45, %v2075_v44 }
 0xc57   : > { %v3235_v47 = vpop.f32.mrf.mxu0 }
 0xc58   : > { %v2164_v48 = vpack.c.bf16 %v2159_v46, %v2159_v46 }
 0xc59   : > { %v2161_v49 = vpop.f32.mrf.mxu0 }
 0xc5a   : > { %3254 = vmatmul.mubr.bf16.vlgmr.msra.gmra.mxu1 %v2164_v48 }
 0xc5b   : > { %v3236_v50 = vpop.f32.mrf.mxu0  ;;  %3293 = vmatprep.mubr.msk.bf16.mxu1 %vm3580_vm0, %v3579_v1  ;;  %3278 = vmatpush3.bf16.msra.mxu1 %v3438_v53 }
 0xc5c   : > { %3279 = vmatprep.subr.bf16.mxu1 %v3579_v1 }
 0xc5f   : > { %3280 = vmatpush3.bf16.msra.mxu1 %v3439_v54 }
 0xc60   : > { %3281 = vmatprep.subr.bf16.mxu1 %v3579_v1 }
 0xc63   : > { %3282 = vmatpush3.bf16.msra.mxu1 %v3440_v18 }
 0xc64   : > { %3283 = vmatprep.subr.bf16.mxu1 %v3579_v1 }
 0xc67   : > { %3284 = vmatpush3.bf16.msra.mxu1 %v3441_v55 }
 0xc68   : > { %3285 = vmatprep.subr.bf16.mxu1 %v3579_v1 }
 0xc6b   : > { %3286 = vmatpush3.bf16.msra.mxu1 %v3442_v56 }
 0xc6c   : > { %3287 = vmatprep.subr.bf16.mxu1 %v3579_v1 }
 0xc6f   : > { %3288 = vmatpush3.bf16.msra.mxu1 %v3443_v58 }
 0xc70   : > { %3289 = vmatprep.subr.bf16.mxu1 %v3579_v1 }
 0xc73   : > { %3290 = vmatpush3.bf16.msra.mxu1 %v3444_v8 }
 0xc74   : > { %3291 = vmatprep.subr.bf16.mxu1 %v3579_v1  ;;  %v2407_v1 = vrot.slane %v4057_v33, %v1426_v35 }
 0xc77   : > { %3292 = vmatpush3.bf16.msra.mxu1 %v3445_v15 }
 0xd1a   : > { %v2268_v61 = vpop.f32.mrf.mxu1 }
 0xd1b   : > { %v2269_v62 = vadd.f32 %v2268_v61, %v2185_v60 }
 0xd1c   : > { %v3255_v63 = vpop.f32.mrf.mxu1 }
 0xd1d   : > { %v2274_v4 = vmax.f32 %v2269_v62, 0.0 }
 0xd1e   : > { %v2271_v5 = vpop.f32.mrf.mxu1 }
 0xd1f   : > { %v2275_v6 = vpack.c.bf16 %v2274_v4, %v2274_v4 }
 0xd20   : > { %v3256_v7 = vpop.f32.mrf.mxu1 }
 0xd21   : > { %3274 = vmatmul.mubr.bf16.vlgmr.msra.gmra.mxu0 %v2275_v6 }
 0xde1   : > { %v2379_v3 = vpop.f32.mrf.mxu0 }
 0xde2   : > { %v2380_v2 = vadd.f32 %v2379_v3, %v2296_v57 }
 0xde3   : > { %v3275_v9 = vpop.f32.mrf.mxu0 }
 0xde4   : > { %v2385_v10 = vmax.f32 %v2380_v2, 0.0 }
 0xde5   : > { %v2382_v11 = vpop.f32.mrf.mxu0 }
 0xde6   : > { %v2386_v36 = vpack.c.bf16 %v2385_v10, %v2385_v10 }
 0xde7   : > { %v3276_v37 = vpop.f32.mrf.mxu0 }
 0xde8   : > { %3294 = vmatmul.mubr.bf16.vlgmr.msra.gmra.mxu1 %v2386_v36 }
 0xea8   : > { %v2490_v38 = vpop.f32.mrf.mxu1 }
 0xea9   : > { %v2491_v34 = vadd.f32 %v2490_v38, %v2407_v1 }
 0xeaa   : > { %v3295_v39 = vpop.f32.mrf.mxu1 }
 0xeab   : > { %2496 = vst [vmem:[%s272_s10] sm:$0xff] %v2491_v34 }
 0xeac   : > { %v2493_v0 = vpop.f32.mrf.mxu1 }
 0xead   : > { %3517 = shalt.err (!%p3514_p1)
}
 0xeae   : > { %s3518_s19 = scalar_lea.hbm %s4185_s14, 128  ;;  %s3522_s28 = scalar_lea.hbm %s4232_s6, 256 }
 0xeaf   : > { %p3519_p2 = scmp.ne.s32.totalorder %s4185_s14, %s3518_s19  ;;  %p3523_p5 = scmp.lt.s32.totalorder %s4185_s14, %s4232_s6 }
 0xeb0   : > { %p3524_p6 = scmp.lt.s32.totalorder %s3522_s28, %s3518_s19 }
 0xeb1   : > { %p3520_p3 = pnand %p3519_p2, %p4245_p13 }
 0xeb2   : > { %p3525_p10 = por %p3524_p6, %p3523_p5 }
 0xeb3   : > { %p3521_p9 = pneg %p3520_p3 }
 0xeb5   : > { %p3526_p12 = pnand %p3525_p10, %p3521_p9 }
 0xeb7   : > { %3529 = shalt.err (!%p3526_p12)
}
 0xeb8   : > { %3306 = dma.vmem_to_hbm [thread:$0]  (%p4245_p13), %s4187_s11, 128, %s4185_s14, %s2498_s15   ;;  %v3296_v35 = vpop.f32.mrf.mxu1 }
 0xeb9 PF: > { %p3323_p4 = scmp.ge.s32.totalorder %s3572_s24, 2  ;;  %s2523_s10 = sand.u32 1, %s3560_s21  }
 0xeba   : > { %p4246_p7 = scmp.ne.s32.totalorder %s4237_s8, 0  ;;  %s2524_s12 = scalar_lea.sflag [#allocation4], %s2523_s10 }
 0xebc   : > { %p3316_p8 = pnand %p3323_p4, %p4246_p7 }
 0xebe   : > { %p3317_p11 = pneg %p3316_p8 }
 0xec0   : > { %3555 = dma.done.wait (%p3317_p11), %s2524_s12, 128  }
 0xec1   : > { %3557 = vsyncadd (%p3317_p11), %s2524_s12, 4294967168  ;;  %p18_p0 = scmp.ge.s32.totalorder %s3643_s27, 4   ;;  %s4247_s21 = smov %s3564_s22 }
 0xec2   : > { %s4248_s22 = smov %s3568_s23  ;;  %s4249_s23 = smov %s3654_s30 }
 0xec3   : > { %s4250_s24 = smov %s3643_s27  ;;  %20 = sbr.rel (!%p18_p0) target bundleno = 5 (0x5), region = 97 }
 0xec8   :  { %2529 = vsyncpa [#allocation3], 1 }
 0xec9   :  { %2531 = vsyncpa [#allocation3 + $0x1], 1 }
 0xeca   :  { %2532 = vsyncpa [#allocation6], 1 }
 0xecb   :  { %2533 = vsyncpa [#allocation4], 1 }
 0xecc   :  { %2535 = vsyncpa [#allocation4 + $0x1], 1 }

</bundles_post_ra>
